<compile_context>
chip_gen: v6e
topology: v6e:2x2x1
jax: 0.10.0
libtpu: 0.0.40
codegen_flags: <defaults>
</compile_context>

<pallas_src>
import jax
import jax.numpy as jnp
from jax.experimental import pallas as pl
from jax.experimental.pallas import tpu as pltpu

LANE = 128
SUB = 16  # bf16 sublane-packed row granularity


def _round_up(x, m):
    return (x + m - 1) // m * m


# ---------------------------------------------------------------------------
# Kernels (x arrives in its native dtype; bf16 cast only for MXU operands)
# ---------------------------------------------------------------------------

def _resnet_fc_kernel_identity(x_ref, w0_ref, b0_ref, w1_ref, b1_ref, o_ref):
    """size_in == size_out: identity shortcut, residual added in f32."""
    x = x_ref[...]                                           # (tile_n, size_in)
    h0 = jnp.maximum(x, 0).astype(w0_ref.dtype)              # relu(x) -> bf16 MXU operand
    net = jnp.dot(h0, w0_ref[...],
                  preferred_element_type=jnp.float32) + b0_ref[...]
    h1 = jnp.maximum(net, 0.0).astype(w1_ref.dtype)
    dx = jnp.dot(h1, w1_ref[...],
                 preferred_element_type=jnp.float32) + b1_ref[...]
    o_ref[...] = (x.astype(jnp.float32) + dx).astype(o_ref.dtype)


def _resnet_fc_kernel_fused_concat(x_ref, w0_ref, b0_ref, wcat_ref, b1_ref, o_ref):
    """Learned shortcut, size_in % 128 == 0, non-v5e: fc_1 + shortcut fused as
    [relu(net) | x] @ concat([w1, ws], axis=0) (K matches the 256-wide MXU)."""
    xb = x_ref[...].astype(wcat_ref.dtype)                   # bf16 copy of x
    h0 = jnp.maximum(xb, 0)
    net = jnp.dot(h0, w0_ref[...],
                  preferred_element_type=jnp.float32) + b0_ref[...]
    h1 = jnp.maximum(net, 0.0).astype(wcat_ref.dtype)
    cat = jnp.concatenate([h1, xb], axis=-1)                  # (tile_n, h_p + size_in)
    out = jnp.dot(cat, wcat_ref[...],
                  preferred_element_type=jnp.float32) + b1_ref[...]
    o_ref[...] = out.astype(o_ref.dtype)


def _resnet_fc_kernel_fused_twodot(x_ref, w0_ref, b0_ref, w1_ref, ws_ref, b1_ref, o_ref):
    """Learned shortcut via two accumulating dots (v5e, or size_in not 128-aligned)."""
    xb = x_ref[...].astype(w0_ref.dtype)
    h0 = jnp.maximum(xb, 0)
    net = jnp.dot(h0, w0_ref[...],
                  preferred_element_type=jnp.float32) + b0_ref[...]
    h1 = jnp.maximum(net, 0.0).astype(w1_ref.dtype)
    out = (jnp.dot(h1, w1_ref[...], preferred_element_type=jnp.float32)
           + jnp.dot(xb, ws_ref[...], preferred_element_type=jnp.float32)
           + b1_ref[...])
    o_ref[...] = out.astype(o_ref.dtype)


# ---------------------------------------------------------------------------
# Hardware query + tile sizing
# ---------------------------------------------------------------------------

def _hw_config():
    vmem_cap = 64 << 20  # conservative default (v7x per-TC VMEM)
    try:
        info = pltpu.get_tpu_info()
        vmem_cap = int(getattr(info, "vmem_capacity_bytes", vmem_cap))
    except Exception:
        pass
    kind = ""
    try:
        kind = jax.devices()[0].device_kind.lower()
    except Exception:
        pass
    return vmem_cap, kind


def _choose_tile_n(n_rows, per_row_bytes, budget_bytes, max_tile, two_cores):
    """Largest 16-aligned row tile fitting the VMEM budget; prefers tiles that
    divide N (no row padding / output row slice); splits rows across the two
    TensorCores only on 2-TC parts (v7x)."""
    tile = max(SUB, min(max_tile, budget_bytes // max(per_row_bytes, 1)))
    tile = min(tile, _round_up(n_rows, SUB))          # don't over-pad small N
    if two_cores and n_rows > SUB:
        # keep (an even) >= 2 grid steps so "parallel" rows can shard across both TCs
        tile = min(tile, _round_up(-(-n_rows // 2), SUB))
    tile = max(SUB, (tile // SUB) * SUB)
    if n_rows % SUB == 0 and n_rows % tile != 0:
        # try a nearby 16-aligned divisor of N to avoid row padding entirely
        for t in range(tile, max(tile // 2, SUB) - 1, -SUB):
            if n_rows % t == 0:
                tile = t
                break
    return int(tile)


# ---------------------------------------------------------------------------
# Wrapper
# ---------------------------------------------------------------------------

def resnet_block_fc(x, params, *, tile_n=None, stream_dtype=jnp.bfloat16,
                    out_dtype=None):
    """Apply ResnetBlockFC.

    x: (N, size_in), any float dtype (streamed as-is; MXU operands cast to
       stream_dtype in-kernel, residual kept in f32).
    params: dict with
      w0: (size_in, size_h), b0: (size_h,)      # fc_0, weight pre-transposed
      w1: (size_h, size_out), b1: (size_out,)   # fc_1, weight pre-transposed
      ws: (size_in, size_out) or None           # shortcut (no bias) / identity
    out_dtype: output dtype (default: x.dtype). Pass jnp.bfloat16 to cut the
      output HBM write in half on this bandwidth-bound kernel.
    """
    N, size_in = x.shape
    size_h = params["w0"].shape[1]
    size_out = params["w1"].shape[1]
    out_dtype = x.dtype if out_dtype is None else out_dtype

    identity = params["ws"] is None
    if identity:
        assert size_in == size_out

    vmem_cap, kind = _hw_config()
    two_cores = ("v7" in kind) or ("7x" in kind)          # 2 TensorCores / chip
    is_v5 = "v5" in kind
    vmem_limit = int(min((vmem_cap * 3) // 4, 96 << 20))  # 48 MiB on v7x, 96 MiB on 128-MiB parts
    max_tile = 2048 if vmem_cap >= (100 << 20) else 1024

    h_p = _round_up(size_h, LANE)   # hidden dim lane-padded (free: weights only)

    def pad2(a, rows, cols):
        return jnp.pad(a, ((0, rows - a.shape[0]), (0, cols - a.shape[1])))

    # One-time weight/bias layout prep (tiny arrays; zero-padding keeps the math exact).
    w0 = pad2(params["w0"], size_in, h_p).astype(stream_dtype)          # (size_in, h_p)
    b0 = jnp.pad(params["b0"], (0, h_p - size_h)).reshape(1, h_p).astype(jnp.float32)
    b1 = params["b1"].reshape(1, size_out).astype(jnp.float32)
    w1 = pad2(params["w1"], h_p, size_out)                              # (h_p, size_out)

    if identity:
        weights = (w0, b0, w1.astype(stream_dtype), b1)
        kernel = _resnet_fc_kernel_identity
    else:
        ws = params["ws"]
        use_concat = (size_in % LANE == 0) and not is_v5
        if use_concat:
            wcat = jnp.concatenate([w1, ws], axis=0).astype(stream_dtype)
            weights = (w0, b0, wcat, b1)
            kernel = _resnet_fc_kernel_fused_concat
        else:
            weights = (w0, b0, w1.astype(stream_dtype), ws.astype(stream_dtype), b1)
            kernel = _resnet_fc_kernel_fused_twodot

    # --- Tile sizing against the per-generation VMEM budget -----------------
    x_item = jnp.dtype(x.dtype).itemsize
    out_item = jnp.dtype(out_dtype).itemsize
    in_v = _round_up(size_in, LANE)     # VMEM lane footprint of a row
    out_v = _round_up(size_out, LANE)
    per_row = 2 * x_item * in_v + 2 * out_item * out_v          # double-buffered I/O tiles
    per_row += 4 * (h_p + out_v) + 4 * (in_v + h_p)             # in-kernel intermediates (over-estimate)
    # Conservatively budget 2 buffers per weight even though Buffered(1) is requested.
    weight_vmem = 2 * sum(int(w.size) * w.dtype.itemsize for w in weights)
    budget = max(vmem_limit - weight_vmem - (6 << 20), 2 << 20)

    if tile_n is None:
        tile_n = _choose_tile_n(N, per_row, budget, max_tile, two_cores)
    tile_n = max(SUB, (int(tile_n) // SUB) * SUB)

    n_p = _round_up(N, tile_n)
    x_in = x
    if n_p != N:
        x_in = jnp.pad(x, ((0, n_p - N), (0, 0)))    # only when N is ragged w.r.t. the tile

    grid = (n_p // tile_n,)
    # x / out blocks: last dim = full array dim (no lane padding, no post-slice).
    x_spec = pl.BlockSpec((tile_n, size_in), lambda i: (i, 0))
    out_spec = pl.BlockSpec((tile_n, size_out), lambda i: (i, 0))

    def weight_specs(buffered):
        specs = []
        for w in weights:
            if buffered:
                specs.append(pl.BlockSpec(w.shape, lambda i: (0, 0),
                                          pipeline_mode=pl.Buffered(1)))
            else:
                specs.append(pl.BlockSpec(w.shape, lambda i: (0, 0)))
        return specs

    def run(buffered):
        return pl.pallas_call(
            kernel,
            out_shape=jax.ShapeDtypeStruct((n_p, size_out), out_dtype),
            grid_spec=pltpu.PrefetchScalarGridSpec(
                num_scalar_prefetch=0,
                grid=grid,
                in_specs=[x_spec] + weight_specs(buffered),
                out_specs=out_spec,
            ),
            compiler_params=pltpu.CompilerParams(
                dimension_semantics=("parallel",),
                vmem_limit_bytes=vmem_limit,
            ),
        )(x_in, *weights)

    try:
        out = run(buffered=hasattr(pl, "Buffered"))
    except Exception:
        # Fall back if single-buffer pipeline_mode is rejected by this JAX build.
        out = run(buffered=False)

    if n_p != N:
        out = out[:N]
    return out


# ---------------------------------------------------------------------------
# Params / reference
# ---------------------------------------------------------------------------

def init_params(key, size_in, size_out=None, size_h=None, zero_w1=True):
    """Parameter init mirroring ResnetBlockFC.__init__ shapes (weights stored
    pre-transposed as (in, out)).  zero_w1=True matches nn.init.zeros_."""
    if size_out is None:
        size_out = size_in
    if size_h is None:
        size_h = min(size_in, size_out)
    k0, k1, k2, k3, k4 = jax.random.split(key, 5)
    w0 = jax.random.normal(k0, (size_in, size_h), jnp.float32) * 0.05
    b0 = jax.random.normal(k1, (size_h,), jnp.float32) * 0.05
    w1 = (jnp.zeros((size_h, size_out), jnp.float32) if zero_w1
          else jax.random.normal(k4, (size_h, size_out), jnp.float32) * 0.05)
    b1 = jax.random.normal(k2, (size_out,), jnp.float32) * 0.05
    ws = (None if size_in == size_out
          else jax.random.normal(k3, (size_in, size_out), jnp.float32) * 0.05)
    return {"w0": w0, "b0": b0, "w1": w1, "b1": b1, "ws": ws}


def resnet_block_fc_ref(x, params):
    """Plain-JAX reference (mirrors the PyTorch forward)."""
    net = jnp.maximum(x, 0.0) @ params["w0"] + params["b0"]
    dx = jnp.maximum(net, 0.0) @ params["w1"] + params["b1"]
    x_s = x if params["ws"] is None else x @ params["ws"]
    return x_s + dx


if __name__ == "__main__":
    key = jax.random.PRNGKey(0)
    kx, kp1, kp2, kp3, kx3, kp4, kx4 = jax.random.split(key, 7)

    # Case 1: learned shortcut, small non-128 widths (two-dot kernel path).
    N, size_in, size_out = 256, 32, 64
    x = jax.random.normal(kx, (N, size_in), jnp.float32)
    params = init_params(kp1, size_in, size_out, zero_w1=False)
    out = jax.block_until_ready(resnet_block_fc(x, params))
    ref = resnet_block_fc_ref(x, params)
    assert out.shape == (N, size_out) and out.dtype == x.dtype
    assert jnp.allclose(out, ref, atol=3e-2, rtol=3e-2), \
        float(jnp.max(jnp.abs(out - ref)))

    # Case 2: identity shortcut (f32 residual), PyTorch-style zero fc_1 weight.
    params_id = init_params(kp2, size_in, zero_w1=True)
    out_id = jax.block_until_ready(resnet_block_fc(x, params_id))
    ref_id = resnet_block_fc_ref(x, params_id)
    assert out_id.shape == (N, size_in)
    assert jnp.allclose(out_id, ref_id, atol=3e-2, rtol=3e-2), \
        float(jnp.max(jnp.abs(out_id - ref_id)))

    # Case 3: ragged N (exercises row padding + output row slice).
    N3 = 200
    x3 = jax.random.normal(kx3, (N3, size_in), jnp.float32)
    params3 = init_params(kp3, size_in, size_out, zero_w1=False)
    out3 = jax.block_until_ready(resnet_block_fc(x3, params3))
    ref3 = resnet_block_fc_ref(x3, params3)
    assert out3.shape == (N3, size_out)
    assert jnp.allclose(out3, ref3, atol=3e-2, rtol=3e-2), \
        float(jnp.max(jnp.abs(out3 - ref3)))

    # Case 4: 128-aligned widths (exercises the fused-concat kernel on v6e/v7x).
    N4, si4, so4 = 192, 128, 256
    x4 = jax.random.normal(kx4, (N4, si4), jnp.float32)
    params4 = init_params(kp4, si4, so4, zero_w1=False)
    out4 = jax.block_until_ready(resnet_block_fc(x4, params4))
    ref4 = resnet_block_fc_ref(x4, params4)
    assert out4.shape == (N4, so4)
    assert jnp.allclose(out4, ref4, atol=3e-2, rtol=3e-2), \
        float(jnp.max(jnp.abs(out4 - ref4)))

    print("KERNEL_OK")
</pallas_src>

<mosaic_0001>
module attributes {stable_mosaic.version = 11 : i64} {
  func.func @_resnet_fc_kernel_fused_twodot(%arg0: i32, %arg1: memref<256x32xf32, #tpu.memory_space<vmem>>, %arg2: memref<32x128xbf16, #tpu.memory_space<vmem>>, %arg3: memref<1x128xf32, #tpu.memory_space<vmem>>, %arg4: memref<128x64xbf16, #tpu.memory_space<vmem>>, %arg5: memref<32x64xbf16, #tpu.memory_space<vmem>>, %arg6: memref<1x64xf32, #tpu.memory_space<vmem>>, %arg7: memref<256x64xf32, #tpu.memory_space<vmem>>) attributes {dimension_semantics = [#tpu.dimension_semantics<parallel>], iteration_bounds = array<i64: 1>, scalar_prefetch = 0 : i64, scratch_operands = 0 : i64, tpu.core_type = #tpu.core_type<tc>, window_params = [{transform_indices = @transform_0, window_bounds = array<i64: 256, 32>}, {pipeline_mode = #tpu.pipeline_mode<synchronous>, transform_indices = @transform_1, window_bounds = array<i64: 32, 128>}, {pipeline_mode = #tpu.pipeline_mode<synchronous>, transform_indices = @transform_2, window_bounds = array<i64: 1, 128>}, {pipeline_mode = #tpu.pipeline_mode<synchronous>, transform_indices = @transform_3, window_bounds = array<i64: 128, 64>}, {pipeline_mode = #tpu.pipeline_mode<synchronous>, transform_indices = @transform_4, window_bounds = array<i64: 32, 64>}, {pipeline_mode = #tpu.pipeline_mode<synchronous>, transform_indices = @transform_5, window_bounds = array<i64: 1, 64>}, {transform_indices = @transform_6, window_bounds = array<i64: 256, 64>}]} {
    %c0 = arith.constant 0 : index
    %c0_0 = arith.constant 0 : index
    %0 = vector.load %arg1[%c0, %c0_0] : memref<256x32xf32, #tpu.memory_space<vmem>>, vector<256x32xf32>
    %1 = arith.truncf %0 : vector<256x32xf32> to vector<256x32xbf16>
    %cst = arith.constant 0.000000e+00 : bf16
    %2 = vector.broadcast %cst : bf16 to vector<256x32xbf16>
    %3 = arith.maximumf %1, %2 : vector<256x32xbf16>
    %c0_1 = arith.constant 0 : index
    %c0_2 = arith.constant 0 : index
    %4 = vector.load %arg2[%c0_1, %c0_2] : memref<32x128xbf16, #tpu.memory_space<vmem>>, vector<32x128xbf16>
    %cst_3 = arith.constant dense<0.000000e+00> : vector<256x128xf32>
    %5 = tpu.matmul %3, %4, %cst_3 {dimension_numbers = #tpu.dot_dimension_numbers<[1], [0], [0], [1], [0, 0, 1, 1], [], []>} : vector<256x32xbf16>, vector<32x128xbf16>, vector<256x128xf32> -> vector<256x128xf32>
    %c0_4 = arith.constant 0 : index
    %c0_5 = arith.constant 0 : index
    %6 = vector.load %arg3[%c0_4, %c0_5] : memref<1x128xf32, #tpu.memory_space<vmem>>, vector<1x128xf32>
    %7 = vector.broadcast %6 : vector<1x128xf32> to vector<256x128xf32>
    %8 = arith.addf %5, %7 : vector<256x128xf32>
    %cst_6 = arith.constant 0.000000e+00 : f32
    %9 = vector.broadcast %cst_6 : f32 to vector<256x128xf32>
    %10 = arith.maximumf %8, %9 : vector<256x128xf32>
    %11 = arith.truncf %10 : vector<256x128xf32> to vector<256x128xbf16>
    %c0_7 = arith.constant 0 : index
    %c0_8 = arith.constant 0 : index
    %12 = vector.load %arg4[%c0_7, %c0_8] : memref<128x64xbf16, #tpu.memory_space<vmem>>, vector<128x64xbf16>
    %cst_9 = arith.constant dense<0.000000e+00> : vector<256x64xf32>
    %13 = tpu.matmul %11, %12, %cst_9 {dimension_numbers = #tpu.dot_dimension_numbers<[1], [0], [0], [1], [0, 0, 1, 1], [], []>} : vector<256x128xbf16>, vector<128x64xbf16>, vector<256x64xf32> -> vector<256x64xf32>
    %c0_10 = arith.constant 0 : index
    %c0_11 = arith.constant 0 : index
    %14 = vector.load %arg5[%c0_10, %c0_11] : memref<32x64xbf16, #tpu.memory_space<vmem>>, vector<32x64xbf16>
    %cst_12 = arith.constant dense<0.000000e+00> : vector<256x64xf32>
    %15 = tpu.matmul %1, %14, %cst_12 {dimension_numbers = #tpu.dot_dimension_numbers<[1], [0], [0], [1], [0, 0, 1, 1], [], []>} : vector<256x32xbf16>, vector<32x64xbf16>, vector<256x64xf32> -> vector<256x64xf32>
    %16 = arith.addf %13, %15 : vector<256x64xf32>
    %c0_13 = arith.constant 0 : index
    %c0_14 = arith.constant 0 : index
    %17 = vector.load %arg6[%c0_13, %c0_14] : memref<1x64xf32, #tpu.memory_space<vmem>>, vector<1x64xf32>
    %18 = vector.broadcast %17 : vector<1x64xf32> to vector<256x64xf32>
    %19 = arith.addf %16, %18 : vector<256x64xf32>
    %c0_15 = arith.constant 0 : index
    %c0_16 = arith.constant 0 : index
    %20 = vector.load %arg7[%c0_15, %c0_16] : memref<256x64xf32, #tpu.memory_space<vmem>>, vector<256x64xf32>
    tpu.vector_store %arg7[%c0_15, %c0_16], %19 {strides = array<i32>} : memref<256x64xf32, #tpu.memory_space<vmem>>, vector<256x64xf32>,
    return
  }
  func.func @transform_0(%arg0: i32) -> (i32, i32) {
    %c0_i32 = arith.constant 0 : i32
    %c0_i32_0 = arith.constant 0 : i32
    return %arg0, %c0_i32 : i32, i32
  }
  func.func @transform_1(%arg0: i32) -> (i32, i32) {
    %c0_i32 = arith.constant 0 : i32
    %c0_i32_0 = arith.constant 0 : i32
    %c0_i32_1 = arith.constant 0 : i32
    return %c0_i32, %c0_i32_0 : i32, i32
  }
  func.func @transform_2(%arg0: i32) -> (i32, i32) {
    %c0_i32 = arith.constant 0 : i32
    %c0_i32_0 = arith.constant 0 : i32
    %c0_i32_1 = arith.constant 0 : i32
    return %c0_i32, %c0_i32_0 : i32, i32
  }
  func.func @transform_3(%arg0: i32) -> (i32, i32) {
    %c0_i32 = arith.constant 0 : i32
    %c0_i32_0 = arith.constant 0 : i32
    %c0_i32_1 = arith.constant 0 : i32
    return %c0_i32, %c0_i32_0 : i32, i32
  }
  func.func @transform_4(%arg0: i32) -> (i32, i32) {
    %c0_i32 = arith.constant 0 : i32
    %c0_i32_0 = arith.constant 0 : i32
    %c0_i32_1 = arith.constant 0 : i32
    return %c0_i32, %c0_i32_0 : i32, i32
  }
  func.func @transform_5(%arg0: i32) -> (i32, i32) {
    %c0_i32 = arith.constant 0 : i32
    %c0_i32_0 = arith.constant 0 : i32
    %c0_i32_1 = arith.constant 0 : i32
    return %c0_i32, %c0_i32_0 : i32, i32
  }
  func.func @transform_6(%arg0: i32) -> (i32, i32) {
    %c0_i32 = arith.constant 0 : i32
    %c0_i32_0 = arith.constant 0 : i32
    return %arg0, %c0_i32 : i32, i32
  }
}

module attributes {stable_mosaic.version = 11 : i64} {
  func.func @_resnet_fc_kernel_fused_twodot(%arg0: i32, %arg1: memref<256x32xf32, #tpu.memory_space<vmem>>, %arg2: memref<32x128xbf16, #tpu.memory_space<vmem>>, %arg3: memref<1x128xf32, #tpu.memory_space<vmem>>, %arg4: memref<128x64xbf16, #tpu.memory_space<vmem>>, %arg5: memref<32x64xbf16, #tpu.memory_space<vmem>>, %arg6: memref<1x64xf32, #tpu.memory_space<vmem>>, %arg7: memref<256x64xf32, #tpu.memory_space<vmem>>) attributes {dimension_semantics = [#tpu.dimension_semantics<parallel>], iteration_bounds = array<i64: 1>, scalar_prefetch = 0 : i64, scratch_operands = 0 : i64, tpu.core_type = #tpu.core_type<tc>, window_params = [{transform_indices = @transform_0, window_bounds = array<i64: 256, 32>}, {pipeline_mode = #tpu.pipeline_mode<synchronous>, transform_indices = @transform_1, window_bounds = array<i64: 32, 128>}, {pipeline_mode = #tpu.pipeline_mode<synchronous>, transform_indices = @transform_2, window_bounds = array<i64: 1, 128>}, {pipeline_mode = #tpu.pipeline_mode<synchronous>, transform_indices = @transform_3, window_bounds = array<i64: 128, 64>}, {pipeline_mode = #tpu.pipeline_mode<synchronous>, transform_indices = @transform_4, window_bounds = array<i64: 32, 64>}, {pipeline_mode = #tpu.pipeline_mode<synchronous>, transform_indices = @transform_5, window_bounds = array<i64: 1, 64>}, {transform_indices = @transform_6, window_bounds = array<i64: 256, 64>}]} {
    %c0 = arith.constant 0 : index
    %c0_0 = arith.constant 0 : index
    %0 = vector.load %arg1[%c0, %c0_0] : memref<256x32xf32, #tpu.memory_space<vmem>>, vector<256x32xf32>
    %1 = arith.truncf %0 : vector<256x32xf32> to vector<256x32xbf16>
    %cst = arith.constant 0.000000e+00 : bf16
    %2 = vector.broadcast %cst : bf16 to vector<256x32xbf16>
    %3 = arith.maximumf %1, %2 : vector<256x32xbf16>
    %c0_1 = arith.constant 0 : index
    %c0_2 = arith.constant 0 : index
    %4 = vector.load %arg2[%c0_1, %c0_2] : memref<32x128xbf16, #tpu.memory_space<vmem>>, vector<32x128xbf16>
    %cst_3 = arith.constant dense<0.000000e+00> : vector<256x128xf32>
    %5 = tpu.matmul %3, %4, %cst_3 {dimension_numbers = #tpu.dot_dimension_numbers<[1], [0], [0], [1], [0, 0, 1, 1], [], []>} : vector<256x32xbf16>, vector<32x128xbf16>, vector<256x128xf32> -> vector<256x128xf32>
    %c0_4 = arith.constant 0 : index
    %c0_5 = arith.constant 0 : index
    %6 = vector.load %arg3[%c0_4, %c0_5] : memref<1x128xf32, #tpu.memory_space<vmem>>, vector<1x128xf32>
    %7 = vector.broadcast %6 : vector<1x128xf32> to vector<256x128xf32>
    %8 = arith.addf %5, %7 : vector<256x128xf32>
    %cst_6 = arith.constant 0.000000e+00 : f32
    %9 = vector.broadcast %cst_6 : f32 to vector<256x128xf32>
    %10 = arith.maximumf %8, %9 : vector<256x128xf32>
    %11 = arith.truncf %10 : vector<256x128xf32> to vector<256x128xbf16>
    %c0_7 = arith.constant 0 : index
    %c0_8 = arith.constant 0 : index
    %12 = vector.load %arg4[%c0_7, %c0_8] : memref<128x64xbf16, #tpu.memory_space<vmem>>, vector<128x64xbf16>
    %cst_9 = arith.constant dense<0.000000e+00> : vector<256x64xf32>
    %13 = tpu.matmul %11, %12, %cst_9 {dimension_numbers = #tpu.dot_dimension_numbers<[1], [0], [0], [1], [0, 0, 1, 1], [], []>} : vector<256x128xbf16>, vector<128x64xbf16>, vector<256x64xf32> -> vector<256x64xf32>
    %c0_10 = arith.constant 0 : index
    %c0_11 = arith.constant 0 : index
    %14 = vector.load %arg5[%c0_10, %c0_11] : memref<32x64xbf16, #tpu.memory_space<vmem>>, vector<32x64xbf16>
    %cst_12 = arith.constant dense<0.000000e+00> : vector<256x64xf32>
    %15 = tpu.matmul %1, %14, %cst_12 {dimension_numbers = #tpu.dot_dimension_numbers<[1], [0], [0], [1], [0, 0, 1, 1], [], []>} : vector<256x32xbf16>, vector<32x64xbf16>, vector<256x64xf32> -> vector<256x64xf32>
    %16 = arith.addf %13, %15 : vector<256x64xf32>
    %c0_13 = arith.constant 0 : index
    %c0_14 = arith.constant 0 : index
    %17 = vector.load %arg6[%c0_13, %c0_14] : memref<1x64xf32, #tpu.memory_space<vmem>>, vector<1x64xf32>
    %18 = vector.broadcast %17 : vector<1x64xf32> to vector<256x64xf32>
    %19 = arith.addf %16, %18 : vector<256x64xf32>
    %c0_15 = arith.constant 0 : index
    %c0_16 = arith.constant 0 : index
    %20 = vector.load %arg7[%c0_15, %c0_16] : memref<256x64xf32, #tpu.memory_space<vmem>>, vector<256x64xf32>
    tpu.vector_store %arg7[%c0_15, %c0_16], %19 {strides = array<i32>} : memref<256x64xf32, #tpu.memory_space<vmem>>, vector<256x64xf32>,
    return
  }
  func.func @transform_0(%arg0: i32) -> (i32, i32) {
    %c0_i32 = arith.constant 0 : i32
    %c0_i32_0 = arith.constant 0 : i32
    return %arg0, %c0_i32 : i32, i32
  }
  func.func @transform_1(%arg0: i32) -> (i32, i32) {
    %c0_i32 = arith.constant 0 : i32
    %c0_i32_0 = arith.constant 0 : i32
    %c0_i32_1 = arith.constant 0 : i32
    return %c0_i32, %c0_i32_0 : i32, i32
  }
  func.func @transform_2(%arg0: i32) -> (i32, i32) {
    %c0_i32 = arith.constant 0 : i32
    %c0_i32_0 = arith.constant 0 : i32
    %c0_i32_1 = arith.constant 0 : i32
    return %c0_i32, %c0_i32_0 : i32, i32
  }
  func.func @transform_3(%arg0: i32) -> (i32, i32) {
    %c0_i32 = arith.constant 0 : i32
    %c0_i32_0 = arith.constant 0 : i32
    %c0_i32_1 = arith.constant 0 : i32
    return %c0_i32, %c0_i32_0 : i32, i32
  }
  func.func @transform_4(%arg0: i32) -> (i32, i32) {
    %c0_i32 = arith.constant 0 : i32
    %c0_i32_0 = arith.constant 0 : i32
    %c0_i32_1 = arith.constant 0 : i32
    return %c0_i32, %c0_i32_0 : i32, i32
  }
  func.func @transform_5(%arg0: i32) -> (i32, i32) {
    %c0_i32 = arith.constant 0 : i32
    %c0_i32_0 = arith.constant 0 : i32
    %c0_i32_1 = arith.constant 0 : i32
    return %c0_i32, %c0_i32_0 : i32, i32
  }
  func.func @transform_6(%arg0: i32) -> (i32, i32) {
    %c0_i32 = arith.constant 0 : i32
    %c0_i32_0 = arith.constant 0 : i32
    return %arg0, %c0_i32 : i32, i32
  }
}

</mosaic_0001>

<bundles_post_ra>
// kernel: tpu_custom_call.1
= control target key start
LH: loop header
LB: loop body
LE: loop exit
PB: predicated region body
PF: predicated region fallthrough
CT: control target
= control target key end

     0   :  { %vm111_vm0 = vcmask 261120   ;;  %v1138_v11 = vmov 0   ;;  %vm858_vm1 = vcmask 523264   ;;  %s1626_s1 = inlined_call_operand.vmem [shape: bf16[32,128], index: 1, kind: input, shape index: {}]   ;;  %s1627_s0 = inlined_call_operand.vmem [shape: f32[256,32], index: 0, kind: input, shape index: {}]   ;;  %s1628_s4 = inlined_call_operand.vmem [shape: bf16[32,64], index: 4, kind: input, shape index: {}]   ;;  %s1629_s3 = inlined_call_operand.vmem [shape: bf16[128,64], index: 3, kind: input, shape index: {}]   ;;  %s1630_s2 = inlined_call_operand.vmem [shape: f32[1,128], index: 2, kind: input, shape index: {}]   ;;  %s1631_s5 = inlined_call_operand.vmem [shape: f32[1,64], index: 5, kind: input, shape index: {}]   ;;  %s1632_s6 = inlined_call_operand.vmem [shape: f32[256,64], index: 6, kind: output, shape index: {}]  }
   0x1   :  { %v1126_v0 = vld [vmem:[%s1626_s1 + $0x8] sm:$0xff]   ;;  %v1127_v1 = vld [vmem:[%s1626_s1] sm:$0xff]   ;;  %v26_v4 = vld [vmem:[%s1627_s0 + $0x10] sm:$0xff] }
   0x2   :  { %1001 = vmatprep.subr.bf16.mxu0 %v1126_v0  ;;  %v24_v2 = vld [vmem:[%s1627_s0] sm:$0xff]  ;;  %v25_v3 = vld [vmem:[%s1627_s0 + $0x8] sm:$0xff]  ;;  %1121 = vmatprep.subr.bf16.mxu1 %v1126_v0  ;;  %v27_v6 = vld [vmem:[%s1627_s0 + $0x18] sm:$0xff] }
   0x3   :  { %1002 = vmatpush3.bf16.msra.mxu0 %v1126_v0  ;;  %v1189_v5 = vpack.c.bf16 %v25_v3, %v24_v2  ;;  %v28_v7 = vld [vmem:[%s1627_s0 + $0x20] sm:$0xff]  ;;  %v29_v8 = vld [vmem:[%s1627_s0 + $0x28] sm:$0xff]  ;;  %1123 = vmatpush3.bf16.msra.mxu1 %v1126_v0  ;;  %v1200_v9 = vpack.c.bf16 %v27_v6, %v26_v4  ;;  %v30_v14 = vld [vmem:[%s1627_s0 + $0x30] sm:$0xff] }
   0x4   :  { %1003 = vmatprep.subr.bf16.mxu0 %v1127_v1  ;;  %v1202_v10 = vpack.c.bf16 %v29_v8, %v28_v7  ;;  %1122 = vmatprep.subr.bf16.mxu1 %v1127_v1  ;;  %v31_v15 = vld [vmem:[%s1627_s0 + $0x38] sm:$0xff]  ;;  %v32_v16 = vld [vmem:[%s1627_s0 + $0x40] sm:$0xff]  ;;  %v33_v18 = vld [vmem:[%s1627_s0 + $0x48] sm:$0xff] }
   0x5   :  { %v72_v12 = vmax.bf16 %v1138_v11, %v1189_v5  ;;  %v73_v13 = vmax.bf16 %v1138_v11, %v1200_v9  ;;  %v40_v19 = vld [vmem:[%s1627_s0 + $0x80] sm:$0xff]  ;;  %v41_v20 = vld [vmem:[%s1627_s0 + $0x88] sm:$0xff]  ;;  %v42_v22 = vld [vmem:[%s1627_s0 + $0x90] sm:$0xff]  ;;  %v1246_v27 = vpack.c.bf16 %v31_v15, %v30_v14  ;;  %v1259_v32 = vpack.c.bf16 %v33_v18, %v32_v16 }
   0x6   :  { %v74_v17 = vmax.bf16 %v1138_v11, %v1202_v10  ;;  %v1229_v21 = vpack.c.bf16 %v41_v20, %v40_v19  ;;  %v43_v23 = vld [vmem:[%s1627_s0 + $0x98] sm:$0xff]  ;;  %v44_v24 = vld [vmem:[%s1627_s0 + $0xa0] sm:$0xff]  ;;  %v45_v26 = vld [vmem:[%s1627_s0 + $0xa8] sm:$0xff] }
   0x7   :  { %1004 = vmatpush3.bf16.msra.mxu0 %v1127_v1  ;;  %1005 = vmatprep.mubr.msk.bf16.mxu0 %vm111_vm0, %v72_v12  ;;  %v1240_v25 = vpack.c.bf16 %v43_v23, %v42_v22  ;;  %v1250_v29 = vpack.c.bf16 %v45_v26, %v44_v24  ;;  %v46_v30 = vld [vmem:[%s1627_s0 + $0xb0] sm:$0xff]  ;;  %v47_v31 = vld [vmem:[%s1627_s0 + $0xb8] sm:$0xff]  ;;  %v48_v34 = vld [vmem:[%s1627_s0 + $0xc0] sm:$0xff]  ;;  %v75_v41 = vmax.bf16 %v1138_v11, %v1246_v27 }
   0x8   :  { %1124 = vmatpush3.bf16.msra.mxu1 %v1127_v1  ;;  %v80_v28 = vmax.bf16 %v1138_v11, %v1229_v21  ;;  %v49_v35 = vld [vmem:[%s1627_s0 + $0xc8] sm:$0xff]  ;;  %v34_v37 = vld [vmem:[%s1627_s0 + $0x50] sm:$0xff]  ;;  %v35_v38 = vld [vmem:[%s1627_s0 + $0x58] sm:$0xff]  ;;  %v1279_v39 = vpack.c.bf16 %v47_v31, %v46_v30  ;;  %v76_v46 = vmax.bf16 %v1138_v11, %v1259_v32 }
   0x9   :  { %v81_v33 = vmax.bf16 %v1138_v11, %v1240_v25  ;;  %v82_v36 = vmax.bf16 %v1138_v11, %v1250_v29  ;;  %v1128_v40 = vld [vmem:[%s1628_s4 + $0x8] sm:$0xff]   ;;  %v36_v42 = vld [vmem:[%s1627_s0 + $0x60] sm:$0xff]  ;;  %v1293_v44 = vpack.c.bf16 %v49_v35, %v48_v34  ;;  %v1129_v45 = vld [vmem:[%s1629_s3 + $0x38] sm:$0xff]   ;;  %v61_v53 = vpack.c.bf16 %v35_v38, %v34_v37 }
   0xa   :  { %1006 = vmatmul.mubr.msk.bf16.vlgmr.msra.gmra.mxu0 %vm111_vm0, %v73_v13  ;;  %1021 = vmatprep.mubr.msk.bf16.mxu1 %vm111_vm0, %v80_v28  ;;  %v37_v43 = vld [vmem:[%s1627_s0 + $0x68] sm:$0xff]  ;;  %v1130_v47 = vld [vmem:[%s1629_s3 + $0x30] sm:$0xff]   ;;  %v51_v49 = vld [vmem:[%s1627_s0 + $0xd8] sm:$0xff]  ;;  %v83_v50 = vmax.bf16 %v1138_v11, %v1279_v39 }
   0xb   :  { %1009 = vmatprep.mubr.msk.bf16.mxu0 %vm111_vm0, %v74_v17  ;;  %1022 = vmatmul.mubr.msk.bf16.vlgmr.msra.gmra.mxu1 %vm111_vm0, %v81_v33  ;;  %v50_v48 = vld [vmem:[%s1627_s0 + $0xd0] sm:$0xff]  ;;  %v52_v51 = vld [vmem:[%s1627_s0 + $0xe0] sm:$0xff]  ;;  %v1131_v52 = vld [vmem:[%s1629_s3 + $0x28] sm:$0xff]   ;;  %v84_v54 = vmax.bf16 %v1138_v11, %v1293_v44  ;;  %v62_v56 = vpack.c.bf16 %v37_v43, %v36_v42  ;;  %v77_v59 = vmax.bf16 %v1138_v11, %v61_v53 }
   0xc   :  { %1025 = vmatprep.mubr.msk.bf16.mxu1 %vm111_vm0, %v82_v36  ;;  %1037 = vmatprep.subr.bf16.mxu1 %v1128_v40  ;;  %v1133_v55 = vld [vmem:[%s1628_s4] sm:$0xff]   ;;  %v53_v57 = vld [vmem:[%s1627_s0 + $0xe8] sm:$0xff]  ;;  %v69_v58 = vpack.c.bf16 %v51_v49, %v50_v48  ;;  %v38_v63 = vld [vmem:[%s1627_s0 + $0x70] sm:$0xff] }
   0xd   :  { %1073 = vmatprep.subr.bf16.mxu0 %v1129_v45  ;;  %1038 = vmatpush3.bf16.msra.mxu1 %v1128_v40  ;;  %v70_v60 = vpack.c.bf16 %v53_v57, %v52_v51  ;;  %v1132_v61 = vld [vmem:[%s1629_s3 + $0x20] sm:$0xff]   ;;  %v78_v62 = vmax.bf16 %v1138_v11, %v62_v56  ;;  %v39_v0 = vld [vmem:[%s1627_s0 + $0x78] sm:$0xff]  ;;  %v54_v4 = vld [vmem:[%s1627_s0 + $0xf0] sm:$0xff] }
   0xe   :  { %1074 = vmatpush3.bf16.msra.mxu0 %v1129_v45  ;;  %1039 = vmatprep.subr.bf16.mxu1 %v1133_v55  ;;  %v85_v1 = vmax.bf16 %v1138_v11, %v69_v58  ;;  %v63_v2 = vpack.c.bf16 %v39_v0, %v38_v63  ;;  %v55_v6 = vld [vmem:[%s1627_s0 + $0xf8] sm:$0xff]  ;;  %v1397_v15 = vld [vmem:[%s1630_s2] ss:$0 sm:$0xff] }
   0xf   :  { %1075 = vmatprep.subr.bf16.mxu0 %v1130_v47  ;;  %v86_v3 = vmax.bf16 %v1138_v11, %v70_v60  ;;  %v1134_v7 = vld [vmem:[%s1629_s3 + $0x18] sm:$0xff]   ;;  %v71_v8 = vpack.c.bf16 %v55_v6, %v54_v4 }
  0x10   :  { %v79_v12 = vmax.bf16 %v1138_v11, %v63_v2 }
  0x11   :  { %1040 = vmatpush3.bf16.msra.mxu1 %v1133_v55  ;;  %v87_v13 = vmax.bf16 %v1138_v11, %v71_v8 }
  0x12   :  { %1010 = vmatmul.mubr.msk.bf16.gmra.mxu0 %vm111_vm0, %v75_v41 }
  0x13   :  { %1013 = vmatprep.mubr.msk.bf16.mxu0 %vm111_vm0, %v76_v46  ;;  %1026 = vmatmul.mubr.msk.bf16.gmra.mxu1 %vm111_vm0, %v83_v50 }
  0x14   :  { %1076 = vmatpush3.bf16.msra.mxu0 %v1130_v47  ;;  %1029 = vmatprep.mubr.msk.bf16.mxu1 %vm111_vm0, %v84_v54 }
  0x15   :  { %1077 = vmatprep.subr.bf16.mxu0 %v1131_v52 }
  0x18   :  { %1078 = vmatpush3.bf16.msra.mxu0 %v1131_v52 }
  0x19   :  { %1079 = vmatprep.subr.bf16.mxu0 %v1132_v61 }
  0x1a   :  { %1014 = vmatmul.mubr.msk.bf16.gmra.mxu0 %vm111_vm0, %v77_v59 }
  0x1b   :  { %1017 = vmatprep.mubr.msk.bf16.mxu0 %vm111_vm0, %v78_v62  ;;  %1030 = vmatmul.mubr.msk.bf16.gmra.mxu1 %vm111_vm0, %v85_v1 }
  0x1c   :  { %1080 = vmatpush3.bf16.msra.mxu0 %v1132_v61  ;;  %1033 = vmatprep.mubr.msk.bf16.mxu1 %vm111_vm0, %v86_v3 }
  0x1d   :  { %1081 = vmatprep.subr.bf16.mxu0 %v1134_v7 }
  0x20   :  { %1082 = vmatpush3.bf16.msra.mxu0 %v1134_v7 }
  0x22   :  { %1018 = vmatmul.mubr.msk.bf16.gmra.mxu0 %vm111_vm0, %v79_v12 }
  0x23   :  { %1034 = vmatmul.mubr.msk.bf16.gmra.mxu1 %vm111_vm0, %v87_v13 }
  0x24   :  { %1041 = vmatprep.mubr.msk.bf16.mxu1 %vm111_vm0, %v1189_v5  ;;  %v1135_v5 = vld [vmem:[%s1629_s3 + $0x10] sm:$0xff]  }
  0x25   :  { %1083 = vmatprep.subr.bf16.mxu0 %v1135_v5 }
  0x26   :  { %1084 = vmatpush3.bf16.msra.mxu0 %v1135_v5 }
  0x2b   :  { %1042 = vmatmul.mubr.msk.bf16.vlgmr.msra.gmra.mxu1 %vm111_vm0, %v1200_v9  ;;  %v1136_v9 = vld [vmem:[%s1629_s3 + $0x8] sm:$0xff]  }
  0x2c   :  { %1045 = vmatprep.mubr.msk.bf16.mxu1 %vm111_vm0, %v1202_v10  ;;  %1085 = vmatprep.subr.bf16.mxu0 %v1136_v9  ;;  %v1137_v10 = vld [vmem:[%s1629_s3] sm:$0xff]  }
  0x2d   :  { %1086 = vmatpush3.bf16.msra.mxu0 %v1136_v9 }
  0x2e   :  { %1087 = vmatprep.subr.bf16.mxu0 %v1137_v10 }
  0x31   :  { %1088 = vmatpush3.bf16.msra.mxu0 %v1137_v10 }
  0x33   :  { %1046 = vmatmul.mubr.msk.bf16.gmra.mxu1 %vm111_vm0, %v1246_v27 }
  0x34   :  { %1049 = vmatprep.mubr.msk.bf16.mxu1 %vm111_vm0, %v1259_v32 }
  0x3b   :  { %1050 = vmatmul.mubr.msk.bf16.gmra.mxu1 %vm111_vm0, %v61_v53 }
  0x3c   :  { %1053 = vmatprep.mubr.msk.bf16.mxu1 %vm111_vm0, %v62_v56 }
  0x43   :  { %1054 = vmatmul.mubr.msk.bf16.gmra.mxu1 %vm111_vm0, %v63_v2 }
  0x44   :  { %1057 = vmatprep.mubr.msk.bf16.mxu1 %vm111_vm0, %v1229_v21 }
  0x4b   :  { %1058 = vmatmul.mubr.msk.bf16.gmra.mxu1 %vm111_vm0, %v1240_v25 }
  0x4c   :  { %1061 = vmatprep.mubr.msk.bf16.mxu1 %vm111_vm0, %v1250_v29 }
  0x53   :  { %1062 = vmatmul.mubr.msk.bf16.gmra.mxu1 %vm111_vm0, %v1279_v39 }
  0x54   :  { %1065 = vmatprep.mubr.msk.bf16.mxu1 %vm111_vm0, %v1293_v44 }
  0x5b   :  { %1066 = vmatmul.mubr.msk.bf16.gmra.mxu1 %vm111_vm0, %v69_v58 }
  0x5c   :  { %1069 = vmatprep.mubr.msk.bf16.mxu1 %vm111_vm0, %v70_v60 }
  0x63   :  { %1070 = vmatmul.mubr.msk.bf16.gmra.mxu1 %vm111_vm0, %v71_v8 }
  0xca   :  { %v1007_v11 = vpop.f32.mrf.mxu0 }
  0xcb   :  { %v1399_v16 = vpop.f32.mrf.mxu1  ;;  %v203_v21 = vadd.f32 %v1007_v11, %v1397_v15 }
  0xcc   :  { %v194_v14 = vpop.f32.mrf.mxu0 }
  0xcd   :  { %v195_v18 = vadd.f32 %v1397_v15, %v194_v14  ;;  %v258_v20 = vpop.f32.mrf.mxu1  ;;  %v323_v30 = vmax.f32 %v203_v21, 0.0 }
  0xce   :  { %v1008_v17 = vpop.f32.mrf.mxu0  ;;  %v259_v3 = vadd.f32 %v1397_v15, %v258_v20 }
  0xcf   :  { %v206_v19 = vadd.f32 %v1008_v17, %v1397_v15  ;;  %v1405_v24 = vpop.f32.mrf.mxu1  ;;  %v321_v27 = vmax.f32 %v195_v18, 0.0 }
  0xd0   :  { %v197_v22 = vpop.f32.mrf.mxu0  ;;  %v337_v10 = vmax.f32 %v259_v3, 0.0 }
  0xd1   :  { %v198_v23 = vadd.f32 %v1397_v15, %v197_v22  ;;  %v324_v25 = vmax.f32 %v206_v19, 0.0  ;;  %v261_v29 = vpop.f32.mrf.mxu1 }
  0xd2   :  { %v1011_v26 = vpop.f32.mrf.mxu0  ;;  %v262_v4 = vadd.f32 %v1397_v15, %v261_v29  ;;  %v270_v29 = vadd.f32 %v1405_v24, %v1397_v15 }
  0xd3   :  { %v322_v28 = vmax.f32 %v198_v23, 0.0  ;;  %v1407_v33 = vpop.f32.mrf.mxu1  ;;  %v354_v34 = vpack.c.bf16 %v324_v25, %v323_v30  ;;  %v219_v39 = vadd.f32 %v1011_v26, %v1397_v15 }
  0xd4   :  { %v210_v31 = vpop.f32.mrf.mxu0  ;;  %v338_v14 = vmax.f32 %v262_v4, 0.0 }
  0xd5   :  { %v353_v32 = vpack.c.bf16 %v322_v28, %v321_v27  ;;  %v211_v36 = vadd.f32 %v1397_v15, %v210_v31  ;;  %v274_v38 = vpop.f32.mrf.mxu1  ;;  %v327_v48 = vmax.f32 %v219_v39, 0.0  ;;  %v267_v27 = vadd.f32 %v1399_v16, %v1397_v15 }
  0xd6   :  { %v1012_v35 = vpop.f32.mrf.mxu0  ;;  %v361_v23 = vpack.c.bf16 %v338_v14, %v337_v10  ;;  %v275_v25 = vadd.f32 %v1397_v15, %v274_v38  ;;  %v283_v16 = vadd.f32 %v1407_v33, %v1397_v15 }
  0xd7   :  { %v222_v37 = vadd.f32 %v1012_v35, %v1397_v15  ;;  %1089 = vmatprep.mubr.bf16.mxu0 %v353_v32  ;;  %v1413_v42 = vpop.f32.mrf.mxu1  ;;  %v325_v45 = vmax.f32 %v211_v36, 0.0  ;;  %v340_v35 = vmax.f32 %v270_v29, 0.0 }
  0xd8   :  { %v213_v40 = vpop.f32.mrf.mxu0  ;;  %1090 = vmatmul.mubr.bf16.vlgmr.msra.gmra.mxu0 %v354_v34  ;;  %v341_v31 = vmax.f32 %v275_v25, 0.0  ;;  %v339_v34 = vmax.f32 %v267_v27, 0.0  ;;  %v286_v24 = vadd.f32 %v1413_v42, %v1397_v15 }
  0xd9   :  { %v214_v41 = vadd.f32 %v1397_v15, %v213_v40  ;;  %v328_v43 = vmax.f32 %v222_v37, 0.0  ;;  %v277_v47 = vpop.f32.mrf.mxu1 }
  0xda   :  { %v1015_v44 = vpop.f32.mrf.mxu0  ;;  %v278_v26 = vadd.f32 %v1397_v15, %v277_v47  ;;  %v362_v40 = vpack.c.bf16 %v340_v35, %v339_v34 }
  0xdb   :  { %v326_v46 = vmax.f32 %v214_v41, 0.0  ;;  %v356_v51 = vpack.c.bf16 %v328_v43, %v327_v48  ;;  %v1415_v53 = vpop.f32.mrf.mxu1  ;;  %v235_v56 = vadd.f32 %v1015_v44, %v1397_v15 }
  0xdc   :  { %v226_v49 = vpop.f32.mrf.mxu0  ;;  %v342_v32 = vmax.f32 %v278_v26, 0.0  ;;  %v299_v33 = vadd.f32 %v1415_v53, %v1397_v15 }
  0xdd   :  { %v355_v50 = vpack.c.bf16 %v326_v46, %v325_v45  ;;  %v227_v54 = vadd.f32 %v1397_v15, %v226_v49  ;;  %v290_v61 = vpop.f32.mrf.mxu1  ;;  %v331_v0 = vmax.f32 %v235_v56, 0.0  ;;  %v343_v45 = vmax.f32 %v283_v16, 0.0 }
  0xde   :  { %v1016_v52 = vpop.f32.mrf.mxu0  ;;  %v363_v37 = vpack.c.bf16 %v342_v32, %v341_v31  ;;  %v291_v38 = vadd.f32 %v1397_v15, %v290_v61  ;;  %v344_v46 = vmax.f32 %v286_v24, 0.0 }
  0xdf   :  { %v238_v55 = vadd.f32 %v1016_v52, %v1397_v15  ;;  %1093 = vmatprep.mubr.bf16.mxu0 %v355_v50  ;;  %v329_v62 = vmax.f32 %v227_v54, 0.0  ;;  %v1032_v8 = vpop.f32.mrf.mxu1 }
  0xe0   :  { %v229_v57 = vpop.f32.mrf.mxu0  ;;  %1094 = vmatmul.mubr.bf16.gmra.mxu0 %v356_v51  ;;  %v345_v43 = vmax.f32 %v291_v38, 0.0  ;;  %v364_v51 = vpack.c.bf16 %v344_v46, %v343_v45  ;;  %v302_v52 = vadd.f32 %v1032_v8, %v1397_v15 }
  0xe1   :  { %v230_v58 = vadd.f32 %v1397_v15, %v229_v57  ;;  %v332_v59 = vmax.f32 %v238_v55, 0.0  ;;  %v293_v18 = vpop.f32.mrf.mxu1  ;;  %v347_v55 = vmax.f32 %v299_v33, 0.0 }
  0xe2   :  { %v1019_v60 = vpop.f32.mrf.mxu0  ;;  %v294_v39 = vadd.f32 %v1397_v15, %v293_v18  ;;  %v348_v56 = vmax.f32 %v302_v52, 0.0 }
  0xe3   :  { %v330_v63 = vmax.f32 %v230_v58, 0.0  ;;  %v358_v6 = vpack.c.bf16 %v332_v59, %v331_v0  ;;  %v251_v5 = vadd.f32 %v1019_v60, %v1397_v15  ;;  %v1035_v30 = vpop.f32.mrf.mxu1 }
  0xe4   :  { %v242_v1 = vpop.f32.mrf.mxu0  ;;  %v346_v44 = vmax.f32 %v294_v39, 0.0  ;;  %v366_v58 = vpack.c.bf16 %v348_v56, %v347_v55  ;;  %v315_v59 = vadd.f32 %v1035_v30, %v1397_v15 }
  0xe5   :  { %v357_v2 = vpack.c.bf16 %v330_v63, %v329_v62  ;;  %v243_v12 = vadd.f32 %v1397_v15, %v242_v1  ;;  %v335_v21 = vmax.f32 %v251_v5, 0.0  ;;  %v306_v36 = vpop.f32.mrf.mxu1 }
  0xe6   :  { %v1020_v7 = vpop.f32.mrf.mxu0  ;;  %v365_v48 = vpack.c.bf16 %v346_v44, %v345_v43  ;;  %v307_v49 = vadd.f32 %v1397_v15, %v306_v36  ;;  %v351_v61 = vmax.f32 %v315_v59, 0.0 }
  0xe7   :  { %v254_v13 = vadd.f32 %v1020_v7, %v1397_v15  ;;  %1097 = vmatprep.mubr.bf16.mxu0 %v357_v2  ;;  %v333_v19 = vmax.f32 %v243_v12, 0.0  ;;  %v1036_v41 = vpop.f32.mrf.mxu1 }
  0xe8   :  { %v245_v9 = vpop.f32.mrf.mxu0  ;;  %1098 = vmatmul.mubr.bf16.gmra.mxu0 %v358_v6  ;;  %v349_v42 = vmax.f32 %v307_v49, 0.0  ;;  %v318_v60 = vadd.f32 %v1036_v41, %v1397_v15 }
  0xe9   :  { %v246_v11 = vadd.f32 %v1397_v15, %v245_v9  ;;  %v336_v17 = vmax.f32 %v254_v13, 0.0  ;;  %v309_v47 = vpop.f32.mrf.mxu1 }
  0xea   :  { %v310_v50 = vadd.f32 %v1397_v15, %v309_v47  ;;  %v352_v62 = vmax.f32 %v318_v60, 0.0 }
  0xeb   :  { %v334_v20 = vmax.f32 %v246_v11, 0.0  ;;  %v360_v28 = vpack.c.bf16 %v336_v17, %v335_v21  ;;  %v1043_v53 = vpop.f32.mrf.mxu1  ;;  %v1455_v17 = vld [vmem:[%s1631_s5] ss:$0 sm:$0xff] }
  0xec   :  { %v350_v54 = vmax.f32 %v310_v50, 0.0  ;;  %v368_v63 = vpack.c.bf16 %v352_v62, %v351_v61 }
  0xed   :  { %v359_v22 = vpack.c.bf16 %v334_v20, %v333_v19  ;;  %v483_v0 = vpop.f32.mrf.mxu1 }
  0xee   :  { %v367_v57 = vpack.c.bf16 %v350_v54, %v349_v42 }
  0xef   :  { %1101 = vmatprep.mubr.bf16.mxu0 %v359_v22  ;;  %v1044_v1 = vpop.f32.mrf.mxu1 }
  0xf0   :  { %1102 = vmatmul.mubr.bf16.gmra.mxu0 %v360_v28 }
  0xf1   :  { %1105 = vmatprep.mubr.bf16.mxu0 %v361_v23  ;;  %v486_v2 = vpop.f32.mrf.mxu1 }
  0xf3   :  { %v1047_v3 = vpop.f32.mrf.mxu1 }
  0xf5   :  { %v499_v4 = vpop.f32.mrf.mxu1 }
  0xf7   :  { %v1048_v6 = vpop.f32.mrf.mxu1 }
  0xf8   :  { %1106 = vmatmul.mubr.bf16.gmra.mxu0 %v362_v40 }
  0xf9   :  { %1109 = vmatprep.mubr.bf16.mxu0 %v363_v37  ;;  %v502_v7 = vpop.f32.mrf.mxu1 }
  0xfb   :  { %v1051_v8 = vpop.f32.mrf.mxu1 }
  0xfd   :  { %v515_v12 = vpop.f32.mrf.mxu1 }
  0xff   :  { %v1052_v13 = vpop.f32.mrf.mxu1 }
 0x100   :  { %1110 = vmatmul.mubr.bf16.gmra.mxu0 %v364_v51 }
 0x101   :  { %1113 = vmatprep.mubr.bf16.mxu0 %v365_v48  ;;  %v518_v5 = vpop.f32.mrf.mxu1 }
 0x103   :  { %v1055_v9 = vpop.f32.mrf.mxu1 }
 0x105   :  { %v1446_v15 = vpop.f32.mrf.mxu1 }
 0x107   :  { %v1448_v10 = vpop.f32.mrf.mxu1 }
 0x108   :  { %1114 = vmatmul.mubr.bf16.gmra.mxu0 %v366_v58 }
 0x109   :  { %1117 = vmatprep.mubr.bf16.mxu0 %v367_v57  ;;  %v1450_v11 = vpop.f32.mrf.mxu1 }
 0x10b   :  { %v1457_v20 = vpop.f32.mrf.mxu1 }
 0x10d   :  { %v1465_v28 = vpop.f32.mrf.mxu1 }
 0x10f   :  { %v1060_v36 = vpop.f32.mrf.mxu1 }
 0x110   :  { %1118 = vmatmul.mubr.bf16.gmra.mxu0 %v368_v63 }
 0x111   :  { %v550_v41 = vpop.f32.mrf.mxu1 }
 0x113   :  { %v1063_v49 = vpop.f32.mrf.mxu1 }
 0x115   :  { %v563_v55 = vpop.f32.mrf.mxu1 }
 0x117   :  { %v1064_v62 = vpop.f32.mrf.mxu1 }
 0x198   :  { %v1091_v14 = vpop.f32.mrf.mxu0 }
 0x199   :  { %v701_v18 = vadd.f32 %v1091_v14, %v1043_v53 }
 0x19a   :  { %v692_v19 = vpop.f32.mrf.mxu0 }
 0x19b   :  { %v828_v21 = vadd.f32 %v1455_v17, %v701_v18  ;;  %v693_v22 = vadd.f32 %v692_v19, %v483_v0 }
 0x19c   :  { %v1092_v23 = vpop.f32.mrf.mxu0 }
 0x19d   :  { %861 = vst.msk [vmem:[%s1632_s6 + $0x10] sm:$0xff] %vm858_vm1, %v828_v21  ;;  %v826_v25 = vadd.f32 %v1455_v17, %v693_v22  ;;  %v704_v26 = vadd.f32 %v1092_v23, %v1044_v1 }
 0x19e   :  { %v695_v27 = vpop.f32.mrf.mxu0 }
 0x19f   :  { %859 = vst.msk [vmem:[%s1632_s6] sm:$0xff] %vm858_vm1, %v826_v25  ;;  %v829_v29 = vadd.f32 %v1455_v17, %v704_v26  ;;  %v696_v30 = vadd.f32 %v695_v27, %v486_v2 }
 0x1a0   :  { %v1095_v31 = vpop.f32.mrf.mxu0 }
 0x1a1   :  { %862 = vst.msk [vmem:[%s1632_s6 + $0x18] sm:$0xff] %vm858_vm1, %v829_v29  ;;  %v827_v32 = vadd.f32 %v1455_v17, %v696_v30  ;;  %v717_v34 = vadd.f32 %v1095_v31, %v1047_v3 }
 0x1a2   :  { %v708_v35 = vpop.f32.mrf.mxu0 }
 0x1a3   :  { %860 = vst.msk [vmem:[%s1632_s6 + $0x8] sm:$0xff] %vm858_vm1, %v827_v32  ;;  %v832_v37 = vadd.f32 %v1455_v17, %v717_v34  ;;  %v709_v38 = vadd.f32 %v708_v35, %v499_v4  ;;  %v566_v4 = vpop.f32.mrf.mxu1 }
 0x1a4   :  { %v1096_v39 = vpop.f32.mrf.mxu0 }
 0x1a5   :  { %865 = vst.msk [vmem:[%s1632_s6 + $0x30] sm:$0xff] %vm858_vm1, %v832_v37  ;;  %v830_v40 = vadd.f32 %v1455_v17, %v709_v38  ;;  %v720_v16 = vadd.f32 %v1096_v39, %v1048_v6 }
 0x1a6   :  { %v711_v24 = vpop.f32.mrf.mxu0 }
 0x1a7   :  { %863 = vst.msk [vmem:[%s1632_s6 + $0x20] sm:$0xff] %vm858_vm1, %v830_v40  ;;  %v833_v43 = vadd.f32 %v1455_v17, %v720_v16  ;;  %v712_v44 = vadd.f32 %v711_v24, %v502_v7 }
 0x1a8   :  { %v1099_v45 = vpop.f32.mrf.mxu0 }
 0x1a9   :  { %866 = vst.msk [vmem:[%s1632_s6 + $0x38] sm:$0xff] %vm858_vm1, %v833_v43  ;;  %v831_v46 = vadd.f32 %v1455_v17, %v712_v44  ;;  %v733_v47 = vadd.f32 %v1099_v45, %v1051_v8 }
 0x1aa   :  { %v724_v48 = vpop.f32.mrf.mxu0 }
 0x1ab   :  { %864 = vst.msk [vmem:[%s1632_s6 + $0x28] sm:$0xff] %vm858_vm1, %v831_v46  ;;  %v836_v50 = vadd.f32 %v1455_v17, %v733_v47  ;;  %v725_v51 = vadd.f32 %v724_v48, %v515_v12 }
 0x1ac   :  { %v1100_v33 = vpop.f32.mrf.mxu0 }
 0x1ad   :  { %869 = vst.msk [vmem:[%s1632_s6 + $0x50] sm:$0xff] %vm858_vm1, %v836_v50  ;;  %v834_v52 = vadd.f32 %v1455_v17, %v725_v51  ;;  %v736_v42 = vadd.f32 %v1100_v33, %v1052_v13 }
 0x1ae   :  { %v727_v54 = vpop.f32.mrf.mxu0 }
 0x1af   :  { %867 = vst.msk [vmem:[%s1632_s6 + $0x40] sm:$0xff] %vm858_vm1, %v834_v52  ;;  %v837_v56 = vadd.f32 %v1455_v17, %v736_v42  ;;  %v728_v57 = vadd.f32 %v727_v54, %v518_v5 }
 0x1b0   :  { %v1103_v58 = vpop.f32.mrf.mxu0 }
 0x1b1   :  { %870 = vst.msk [vmem:[%s1632_s6 + $0x58] sm:$0xff] %vm858_vm1, %v837_v56  ;;  %v835_v59 = vadd.f32 %v1455_v17, %v728_v57  ;;  %v749_v60 = vadd.f32 %v1103_v58, %v1055_v9  ;;  %v1067_v9 = vpop.f32.mrf.mxu1 }
 0x1b2   :  { %v740_v61 = vpop.f32.mrf.mxu0 }
 0x1b3   :  { %868 = vst.msk [vmem:[%s1632_s6 + $0x48] sm:$0xff] %vm858_vm1, %v835_v59  ;;  %v840_v63 = vadd.f32 %v1455_v17, %v749_v60  ;;  %v741_v53 = vadd.f32 %v740_v61, %v1446_v15 }
 0x1b4   :  { %v1104_v0 = vpop.f32.mrf.mxu0 }
 0x1b5   :  { %873 = vst.msk [vmem:[%s1632_s6 + $0x70] sm:$0xff] %vm858_vm1, %v840_v63  ;;  %v838_v1 = vadd.f32 %v1455_v17, %v741_v53  ;;  %v752_v2 = vadd.f32 %v1104_v0, %v1448_v10 }
 0x1b6   :  { %v743_v3 = vpop.f32.mrf.mxu0 }
 0x1b7   :  { %871 = vst.msk [vmem:[%s1632_s6 + $0x60] sm:$0xff] %vm858_vm1, %v838_v1  ;;  %v841_v6 = vadd.f32 %v1455_v17, %v752_v2  ;;  %v744_v7 = vadd.f32 %v743_v3, %v1450_v11 }
 0x1b8   :  { %v1107_v8 = vpop.f32.mrf.mxu0 }
 0x1b9   :  { %874 = vst.msk [vmem:[%s1632_s6 + $0x78] sm:$0xff] %vm858_vm1, %v841_v6  ;;  %v839_v12 = vadd.f32 %v1455_v17, %v744_v7  ;;  %v765_v13 = vadd.f32 %v1107_v8, %v1457_v20  ;;  %v579_v20 = vpop.f32.mrf.mxu1 }
 0x1ba   :  { %v756_v5 = vpop.f32.mrf.mxu0 }
 0x1bb   :  { %872 = vst.msk [vmem:[%s1632_s6 + $0x68] sm:$0xff] %vm858_vm1, %v839_v12  ;;  %v844_v15 = vadd.f32 %v1455_v17, %v765_v13  ;;  %v757_v10 = vadd.f32 %v756_v5, %v1465_v28  ;;  %v1068_v28 = vpop.f32.mrf.mxu1 }
 0x1bc   :  { %v1108_v11 = vpop.f32.mrf.mxu0 }
 0x1bd   :  { %877 = vst.msk [vmem:[%s1632_s6 + $0x90] sm:$0xff] %vm858_vm1, %v844_v15  ;;  %v842_v14 = vadd.f32 %v1455_v17, %v757_v10  ;;  %v768_v18 = vadd.f32 %v1108_v11, %v1060_v36  ;;  %v582_v36 = vpop.f32.mrf.mxu1 }
 0x1be   :  { %v759_v19 = vpop.f32.mrf.mxu0 }
 0x1bf   :  { %875 = vst.msk [vmem:[%s1632_s6 + $0x80] sm:$0xff] %vm858_vm1, %v842_v14  ;;  %v845_v21 = vadd.f32 %v1455_v17, %v768_v18  ;;  %v760_v22 = vadd.f32 %v759_v19, %v550_v41  ;;  %v1071_v24 = vpop.f32.mrf.mxu1 }
 0x1c0   :  { %v1111_v23 = vpop.f32.mrf.mxu0 }
 0x1c1   :  { %878 = vst.msk [vmem:[%s1632_s6 + $0x98] sm:$0xff] %vm858_vm1, %v845_v21  ;;  %v843_v25 = vadd.f32 %v1455_v17, %v760_v22  ;;  %v781_v26 = vadd.f32 %v1111_v23, %v1063_v49  ;;  %v595_v48 = vpop.f32.mrf.mxu1 }
 0x1c2   :  { %v772_v27 = vpop.f32.mrf.mxu0 }
 0x1c3   :  { %876 = vst.msk [vmem:[%s1632_s6 + $0x88] sm:$0xff] %vm858_vm1, %v843_v25  ;;  %v848_v29 = vadd.f32 %v1455_v17, %v781_v26  ;;  %v773_v30 = vadd.f32 %v772_v27, %v563_v55  ;;  %v1072_v54 = vpop.f32.mrf.mxu1 }
 0x1c4   :  { %v1112_v31 = vpop.f32.mrf.mxu0 }
 0x1c5   :  { %881 = vst.msk [vmem:[%s1632_s6 + $0xb0] sm:$0xff] %vm858_vm1, %v848_v29  ;;  %v846_v32 = vadd.f32 %v1455_v17, %v773_v30  ;;  %v784_v34 = vadd.f32 %v1112_v31, %v1064_v62  ;;  %v598_v61 = vpop.f32.mrf.mxu1 }
 0x1c6   :  { %v775_v35 = vpop.f32.mrf.mxu0 }
 0x1c7   :  { %879 = vst.msk [vmem:[%s1632_s6 + $0xa0] sm:$0xff] %vm858_vm1, %v846_v32  ;;  %v849_v37 = vadd.f32 %v1455_v17, %v784_v34  ;;  %v776_v38 = vadd.f32 %v775_v35, %v566_v4 }
 0x1c8   :  { %v1115_v39 = vpop.f32.mrf.mxu0 }
 0x1c9   :  { %882 = vst.msk [vmem:[%s1632_s6 + $0xb8] sm:$0xff] %vm858_vm1, %v849_v37  ;;  %v847_v40 = vadd.f32 %v1455_v17, %v776_v38  ;;  %v797_v16 = vadd.f32 %v1115_v39, %v1067_v9 }
 0x1ca   :  { %v788_v41 = vpop.f32.mrf.mxu0 }
 0x1cb   :  { %880 = vst.msk [vmem:[%s1632_s6 + $0xa8] sm:$0xff] %vm858_vm1, %v847_v40  ;;  %v852_v43 = vadd.f32 %v1455_v17, %v797_v16  ;;  %v789_v44 = vadd.f32 %v788_v41, %v579_v20 }
 0x1cc   :  { %v1116_v45 = vpop.f32.mrf.mxu0 }
 0x1cd   :  { %885 = vst.msk [vmem:[%s1632_s6 + $0xd0] sm:$0xff] %vm858_vm1, %v852_v43  ;;  %v850_v46 = vadd.f32 %v1455_v17, %v789_v44  ;;  %v800_v47 = vadd.f32 %v1116_v45, %v1068_v28 }
 0x1ce   :  { %v791_v49 = vpop.f32.mrf.mxu0 }
 0x1cf   :  { %883 = vst.msk [vmem:[%s1632_s6 + $0xc0] sm:$0xff] %vm858_vm1, %v850_v46  ;;  %v853_v50 = vadd.f32 %v1455_v17, %v800_v47  ;;  %v792_v51 = vadd.f32 %v791_v49, %v582_v36 }
 0x1d0   :  { %v1119_v33 = vpop.f32.mrf.mxu0 }
 0x1d1   :  { %886 = vst.msk [vmem:[%s1632_s6 + $0xd8] sm:$0xff] %vm858_vm1, %v853_v50  ;;  %v851_v52 = vadd.f32 %v1455_v17, %v792_v51  ;;  %v813_v42 = vadd.f32 %v1119_v33, %v1071_v24 }
 0x1d2   :  { %v804_v55 = vpop.f32.mrf.mxu0 }
 0x1d3   :  { %884 = vst.msk [vmem:[%s1632_s6 + $0xc8] sm:$0xff] %vm858_vm1, %v851_v52  ;;  %v856_v56 = vadd.f32 %v1455_v17, %v813_v42  ;;  %v805_v57 = vadd.f32 %v804_v55, %v595_v48 }
 0x1d4   :  { %v1120_v58 = vpop.f32.mrf.mxu0 }
 0x1d5   :  { %889 = vst.msk [vmem:[%s1632_s6 + $0xf0] sm:$0xff] %vm858_vm1, %v856_v56  ;;  %v854_v59 = vadd.f32 %v1455_v17, %v805_v57  ;;  %v816_v60 = vadd.f32 %v1120_v58, %v1072_v54 }
 0x1d6   :  { %v807_v62 = vpop.f32.mrf.mxu0 }
 0x1d7   :  { %887 = vst.msk [vmem:[%s1632_s6 + $0xe0] sm:$0xff] %vm858_vm1, %v854_v59  ;;  %v857_v63 = vadd.f32 %v1455_v17, %v816_v60  ;;  %v808_v53 = vadd.f32 %v807_v62, %v598_v61 }
 0x1d9   :  { %890 = vst.msk [vmem:[%s1632_s6 + $0xf8] sm:$0xff] %vm858_vm1, %v857_v63  ;;  %v855_v0 = vadd.f32 %v1455_v17, %v808_v53 }
 0x1db   :  { %888 = vst.msk [vmem:[%s1632_s6 + $0xe8] sm:$0xff] %vm858_vm1, %v855_v0 }

// kernel: tpu_custom_call.1
= control target key start
LH: loop header
LB: loop body
LE: loop exit
PB: predicated region body
PF: predicated region fallthrough
CT: control target
= control target key end

     0   :  { %vm111_vm0 = vcmask 261120   ;;  %v1138_v11 = vmov 0   ;;  %vm858_vm1 = vcmask 523264   ;;  %s1626_s1 = inlined_call_operand.vmem [shape: bf16[32,128], index: 1, kind: input, shape index: {}]   ;;  %s1627_s0 = inlined_call_operand.vmem [shape: f32[256,32], index: 0, kind: input, shape index: {}]   ;;  %s1628_s4 = inlined_call_operand.vmem [shape: bf16[32,64], index: 4, kind: input, shape index: {}]   ;;  %s1629_s3 = inlined_call_operand.vmem [shape: bf16[128,64], index: 3, kind: input, shape index: {}]   ;;  %s1630_s2 = inlined_call_operand.vmem [shape: f32[1,128], index: 2, kind: input, shape index: {}]   ;;  %s1631_s5 = inlined_call_operand.vmem [shape: f32[1,64], index: 5, kind: input, shape index: {}]   ;;  %s1632_s6 = inlined_call_operand.vmem [shape: f32[256,64], index: 6, kind: output, shape index: {}]  }
   0x1   :  { %v1126_v0 = vld [vmem:[%s1626_s1 + $0x8] sm:$0xff]   ;;  %v1127_v1 = vld [vmem:[%s1626_s1] sm:$0xff]   ;;  %v26_v4 = vld [vmem:[%s1627_s0 + $0x10] sm:$0xff] }
   0x2   :  { %1001 = vmatprep.subr.bf16.mxu0 %v1126_v0  ;;  %v24_v2 = vld [vmem:[%s1627_s0] sm:$0xff]  ;;  %v25_v3 = vld [vmem:[%s1627_s0 + $0x8] sm:$0xff]  ;;  %1121 = vmatprep.subr.bf16.mxu1 %v1126_v0  ;;  %v27_v6 = vld [vmem:[%s1627_s0 + $0x18] sm:$0xff] }
   0x3   :  { %1002 = vmatpush3.bf16.msra.mxu0 %v1126_v0  ;;  %v1189_v5 = vpack.c.bf16 %v25_v3, %v24_v2  ;;  %v28_v7 = vld [vmem:[%s1627_s0 + $0x20] sm:$0xff]  ;;  %v29_v8 = vld [vmem:[%s1627_s0 + $0x28] sm:$0xff]  ;;  %1123 = vmatpush3.bf16.msra.mxu1 %v1126_v0  ;;  %v1200_v9 = vpack.c.bf16 %v27_v6, %v26_v4  ;;  %v30_v14 = vld [vmem:[%s1627_s0 + $0x30] sm:$0xff] }
   0x4   :  { %1003 = vmatprep.subr.bf16.mxu0 %v1127_v1  ;;  %v1202_v10 = vpack.c.bf16 %v29_v8, %v28_v7  ;;  %1122 = vmatprep.subr.bf16.mxu1 %v1127_v1  ;;  %v31_v15 = vld [vmem:[%s1627_s0 + $0x38] sm:$0xff]  ;;  %v32_v16 = vld [vmem:[%s1627_s0 + $0x40] sm:$0xff]  ;;  %v33_v18 = vld [vmem:[%s1627_s0 + $0x48] sm:$0xff] }
   0x5   :  { %v72_v12 = vmax.bf16 %v1138_v11, %v1189_v5  ;;  %v73_v13 = vmax.bf16 %v1138_v11, %v1200_v9  ;;  %v40_v19 = vld [vmem:[%s1627_s0 + $0x80] sm:$0xff]  ;;  %v41_v20 = vld [vmem:[%s1627_s0 + $0x88] sm:$0xff]  ;;  %v42_v22 = vld [vmem:[%s1627_s0 + $0x90] sm:$0xff]  ;;  %v1246_v27 = vpack.c.bf16 %v31_v15, %v30_v14  ;;  %v1259_v32 = vpack.c.bf16 %v33_v18, %v32_v16 }
   0x6   :  { %v74_v17 = vmax.bf16 %v1138_v11, %v1202_v10  ;;  %v1229_v21 = vpack.c.bf16 %v41_v20, %v40_v19  ;;  %v43_v23 = vld [vmem:[%s1627_s0 + $0x98] sm:$0xff]  ;;  %v44_v24 = vld [vmem:[%s1627_s0 + $0xa0] sm:$0xff]  ;;  %v45_v26 = vld [vmem:[%s1627_s0 + $0xa8] sm:$0xff] }
   0x7   :  { %1004 = vmatpush3.bf16.msra.mxu0 %v1127_v1  ;;  %1005 = vmatprep.mubr.msk.bf16.mxu0 %vm111_vm0, %v72_v12  ;;  %v1240_v25 = vpack.c.bf16 %v43_v23, %v42_v22  ;;  %v1250_v29 = vpack.c.bf16 %v45_v26, %v44_v24  ;;  %v46_v30 = vld [vmem:[%s1627_s0 + $0xb0] sm:$0xff]  ;;  %v47_v31 = vld [vmem:[%s1627_s0 + $0xb8] sm:$0xff]  ;;  %v48_v34 = vld [vmem:[%s1627_s0 + $0xc0] sm:$0xff]  ;;  %v75_v41 = vmax.bf16 %v1138_v11, %v1246_v27 }
   0x8   :  { %1124 = vmatpush3.bf16.msra.mxu1 %v1127_v1  ;;  %v80_v28 = vmax.bf16 %v1138_v11, %v1229_v21  ;;  %v49_v35 = vld [vmem:[%s1627_s0 + $0xc8] sm:$0xff]  ;;  %v34_v37 = vld [vmem:[%s1627_s0 + $0x50] sm:$0xff]  ;;  %v35_v38 = vld [vmem:[%s1627_s0 + $0x58] sm:$0xff]  ;;  %v1279_v39 = vpack.c.bf16 %v47_v31, %v46_v30  ;;  %v76_v46 = vmax.bf16 %v1138_v11, %v1259_v32 }
   0x9   :  { %v81_v33 = vmax.bf16 %v1138_v11, %v1240_v25  ;;  %v82_v36 = vmax.bf16 %v1138_v11, %v1250_v29  ;;  %v1128_v40 = vld [vmem:[%s1628_s4 + $0x8] sm:$0xff]   ;;  %v36_v42 = vld [vmem:[%s1627_s0 + $0x60] sm:$0xff]  ;;  %v1293_v44 = vpack.c.bf16 %v49_v35, %v48_v34  ;;  %v1129_v45 = vld [vmem:[%s1629_s3 + $0x38] sm:$0xff]   ;;  %v61_v53 = vpack.c.bf16 %v35_v38, %v34_v37 }
   0xa   :  { %1006 = vmatmul.mubr.msk.bf16.vlgmr.msra.gmra.mxu0 %vm111_vm0, %v73_v13  ;;  %1021 = vmatprep.mubr.msk.bf16.mxu1 %vm111_vm0, %v80_v28  ;;  %v37_v43 = vld [vmem:[%s1627_s0 + $0x68] sm:$0xff]  ;;  %v1130_v47 = vld [vmem:[%s1629_s3 + $0x30] sm:$0xff]   ;;  %v51_v49 = vld [vmem:[%s1627_s0 + $0xd8] sm:$0xff]  ;;  %v83_v50 = vmax.bf16 %v1138_v11, %v1279_v39 }
   0xb   :  { %1009 = vmatprep.mubr.msk.bf16.mxu0 %vm111_vm0, %v74_v17  ;;  %1022 = vmatmul.mubr.msk.bf16.vlgmr.msra.gmra.mxu1 %vm111_vm0, %v81_v33  ;;  %v50_v48 = vld [vmem:[%s1627_s0 + $0xd0] sm:$0xff]  ;;  %v52_v51 = vld [vmem:[%s1627_s0 + $0xe0] sm:$0xff]  ;;  %v1131_v52 = vld [vmem:[%s1629_s3 + $0x28] sm:$0xff]   ;;  %v84_v54 = vmax.bf16 %v1138_v11, %v1293_v44  ;;  %v62_v56 = vpack.c.bf16 %v37_v43, %v36_v42  ;;  %v77_v59 = vmax.bf16 %v1138_v11, %v61_v53 }
   0xc   :  { %1025 = vmatprep.mubr.msk.bf16.mxu1 %vm111_vm0, %v82_v36  ;;  %1037 = vmatprep.subr.bf16.mxu1 %v1128_v40  ;;  %v1133_v55 = vld [vmem:[%s1628_s4] sm:$0xff]   ;;  %v53_v57 = vld [vmem:[%s1627_s0 + $0xe8] sm:$0xff]  ;;  %v69_v58 = vpack.c.bf16 %v51_v49, %v50_v48  ;;  %v38_v63 = vld [vmem:[%s1627_s0 + $0x70] sm:$0xff] }
   0xd   :  { %1073 = vmatprep.subr.bf16.mxu0 %v1129_v45  ;;  %1038 = vmatpush3.bf16.msra.mxu1 %v1128_v40  ;;  %v70_v60 = vpack.c.bf16 %v53_v57, %v52_v51  ;;  %v1132_v61 = vld [vmem:[%s1629_s3 + $0x20] sm:$0xff]   ;;  %v78_v62 = vmax.bf16 %v1138_v11, %v62_v56  ;;  %v39_v0 = vld [vmem:[%s1627_s0 + $0x78] sm:$0xff]  ;;  %v54_v4 = vld [vmem:[%s1627_s0 + $0xf0] sm:$0xff] }
   0xe   :  { %1074 = vmatpush3.bf16.msra.mxu0 %v1129_v45  ;;  %1039 = vmatprep.subr.bf16.mxu1 %v1133_v55  ;;  %v85_v1 = vmax.bf16 %v1138_v11, %v69_v58  ;;  %v63_v2 = vpack.c.bf16 %v39_v0, %v38_v63  ;;  %v55_v6 = vld [vmem:[%s1627_s0 + $0xf8] sm:$0xff]  ;;  %v1397_v15 = vld [vmem:[%s1630_s2] ss:$0 sm:$0xff] }
   0xf   :  { %1075 = vmatprep.subr.bf16.mxu0 %v1130_v47  ;;  %v86_v3 = vmax.bf16 %v1138_v11, %v70_v60  ;;  %v1134_v7 = vld [vmem:[%s1629_s3 + $0x18] sm:$0xff]   ;;  %v71_v8 = vpack.c.bf16 %v55_v6, %v54_v4 }
  0x10   :  { %v79_v12 = vmax.bf16 %v1138_v11, %v63_v2 }
  0x11   :  { %1040 = vmatpush3.bf16.msra.mxu1 %v1133_v55  ;;  %v87_v13 = vmax.bf16 %v1138_v11, %v71_v8 }
  0x12   :  { %1010 = vmatmul.mubr.msk.bf16.gmra.mxu0 %vm111_vm0, %v75_v41 }
  0x13   :  { %1013 = vmatprep.mubr.msk.bf16.mxu0 %vm111_vm0, %v76_v46  ;;  %1026 = vmatmul.mubr.msk.bf16.gmra.mxu1 %vm111_vm0, %v83_v50 }
  0x14   :  { %1076 = vmatpush3.bf16.msra.mxu0 %v1130_v47  ;;  %1029 = vmatprep.mubr.msk.bf16.mxu1 %vm111_vm0, %v84_v54 }
  0x15   :  { %1077 = vmatprep.subr.bf16.mxu0 %v1131_v52 }
  0x18   :  { %1078 = vmatpush3.bf16.msra.mxu0 %v1131_v52 }
  0x19   :  { %1079 = vmatprep.subr.bf16.mxu0 %v1132_v61 }
  0x1a   :  { %1014 = vmatmul.mubr.msk.bf16.gmra.mxu0 %vm111_vm0, %v77_v59 }
  0x1b   :  { %1017 = vmatprep.mubr.msk.bf16.mxu0 %vm111_vm0, %v78_v62  ;;  %1030 = vmatmul.mubr.msk.bf16.gmra.mxu1 %vm111_vm0, %v85_v1 }
  0x1c   :  { %1080 = vmatpush3.bf16.msra.mxu0 %v1132_v61  ;;  %1033 = vmatprep.mubr.msk.bf16.mxu1 %vm111_vm0, %v86_v3 }
  0x1d   :  { %1081 = vmatprep.subr.bf16.mxu0 %v1134_v7 }
  0x20   :  { %1082 = vmatpush3.bf16.msra.mxu0 %v1134_v7 }
  0x22   :  { %1018 = vmatmul.mubr.msk.bf16.gmra.mxu0 %vm111_vm0, %v79_v12 }
  0x23   :  { %1034 = vmatmul.mubr.msk.bf16.gmra.mxu1 %vm111_vm0, %v87_v13 }
  0x24   :  { %1041 = vmatprep.mubr.msk.bf16.mxu1 %vm111_vm0, %v1189_v5  ;;  %v1135_v5 = vld [vmem:[%s1629_s3 + $0x10] sm:$0xff]  }
  0x25   :  { %1083 = vmatprep.subr.bf16.mxu0 %v1135_v5 }
  0x26   :  { %1084 = vmatpush3.bf16.msra.mxu0 %v1135_v5 }
  0x2b   :  { %1042 = vmatmul.mubr.msk.bf16.vlgmr.msra.gmra.mxu1 %vm111_vm0, %v1200_v9  ;;  %v1136_v9 = vld [vmem:[%s1629_s3 + $0x8] sm:$0xff]  }
  0x2c   :  { %1045 = vmatprep.mubr.msk.bf16.mxu1 %vm111_vm0, %v1202_v10  ;;  %1085 = vmatprep.subr.bf16.mxu0 %v1136_v9  ;;  %v1137_v10 = vld [vmem:[%s1629_s3] sm:$0xff]  }
  0x2d   :  { %1086 = vmatpush3.bf16.msra.mxu0 %v1136_v9 }
  0x2e   :  { %1087 = vmatprep.subr.bf16.mxu0 %v1137_v10 }
  0x31   :  { %1088 = vmatpush3.bf16.msra.mxu0 %v1137_v10 }
  0x33   :  { %1046 = vmatmul.mubr.msk.bf16.gmra.mxu1 %vm111_vm0, %v1246_v27 }
  0x34   :  { %1049 = vmatprep.mubr.msk.bf16.mxu1 %vm111_vm0, %v1259_v32 }
  0x3b   :  { %1050 = vmatmul.mubr.msk.bf16.gmra.mxu1 %vm111_vm0, %v61_v53 }
  0x3c   :  { %1053 = vmatprep.mubr.msk.bf16.mxu1 %vm111_vm0, %v62_v56 }
  0x43   :  { %1054 = vmatmul.mubr.msk.bf16.gmra.mxu1 %vm111_vm0, %v63_v2 }
  0x44   :  { %1057 = vmatprep.mubr.msk.bf16.mxu1 %vm111_vm0, %v1229_v21 }
  0x4b   :  { %1058 = vmatmul.mubr.msk.bf16.gmra.mxu1 %vm111_vm0, %v1240_v25 }
  0x4c   :  { %1061 = vmatprep.mubr.msk.bf16.mxu1 %vm111_vm0, %v1250_v29 }
  0x53   :  { %1062 = vmatmul.mubr.msk.bf16.gmra.mxu1 %vm111_vm0, %v1279_v39 }
  0x54   :  { %1065 = vmatprep.mubr.msk.bf16.mxu1 %vm111_vm0, %v1293_v44 }
  0x5b   :  { %1066 = vmatmul.mubr.msk.bf16.gmra.mxu1 %vm111_vm0, %v69_v58 }
  0x5c   :  { %1069 = vmatprep.mubr.msk.bf16.mxu1 %vm111_vm0, %v70_v60 }
  0x63   :  { %1070 = vmatmul.mubr.msk.bf16.gmra.mxu1 %vm111_vm0, %v71_v8 }
  0xca   :  { %v1007_v11 = vpop.f32.mrf.mxu0 }
  0xcb   :  { %v1399_v16 = vpop.f32.mrf.mxu1  ;;  %v203_v21 = vadd.f32 %v1007_v11, %v1397_v15 }
  0xcc   :  { %v194_v14 = vpop.f32.mrf.mxu0 }
  0xcd   :  { %v195_v18 = vadd.f32 %v1397_v15, %v194_v14  ;;  %v258_v20 = vpop.f32.mrf.mxu1  ;;  %v323_v30 = vmax.f32 %v203_v21, 0.0 }
  0xce   :  { %v1008_v17 = vpop.f32.mrf.mxu0  ;;  %v259_v3 = vadd.f32 %v1397_v15, %v258_v20 }
  0xcf   :  { %v206_v19 = vadd.f32 %v1008_v17, %v1397_v15  ;;  %v1405_v24 = vpop.f32.mrf.mxu1  ;;  %v321_v27 = vmax.f32 %v195_v18, 0.0 }
  0xd0   :  { %v197_v22 = vpop.f32.mrf.mxu0  ;;  %v337_v10 = vmax.f32 %v259_v3, 0.0 }
  0xd1   :  { %v198_v23 = vadd.f32 %v1397_v15, %v197_v22  ;;  %v324_v25 = vmax.f32 %v206_v19, 0.0  ;;  %v261_v29 = vpop.f32.mrf.mxu1 }
  0xd2   :  { %v1011_v26 = vpop.f32.mrf.mxu0  ;;  %v262_v4 = vadd.f32 %v1397_v15, %v261_v29  ;;  %v270_v29 = vadd.f32 %v1405_v24, %v1397_v15 }
  0xd3   :  { %v322_v28 = vmax.f32 %v198_v23, 0.0  ;;  %v1407_v33 = vpop.f32.mrf.mxu1  ;;  %v354_v34 = vpack.c.bf16 %v324_v25, %v323_v30  ;;  %v219_v39 = vadd.f32 %v1011_v26, %v1397_v15 }
  0xd4   :  { %v210_v31 = vpop.f32.mrf.mxu0  ;;  %v338_v14 = vmax.f32 %v262_v4, 0.0 }
  0xd5   :  { %v353_v32 = vpack.c.bf16 %v322_v28, %v321_v27  ;;  %v211_v36 = vadd.f32 %v1397_v15, %v210_v31  ;;  %v274_v38 = vpop.f32.mrf.mxu1  ;;  %v327_v48 = vmax.f32 %v219_v39, 0.0  ;;  %v267_v27 = vadd.f32 %v1399_v16, %v1397_v15 }
  0xd6   :  { %v1012_v35 = vpop.f32.mrf.mxu0  ;;  %v361_v23 = vpack.c.bf16 %v338_v14, %v337_v10  ;;  %v275_v25 = vadd.f32 %v1397_v15, %v274_v38  ;;  %v283_v16 = vadd.f32 %v1407_v33, %v1397_v15 }
  0xd7   :  { %v222_v37 = vadd.f32 %v1012_v35, %v1397_v15  ;;  %1089 = vmatprep.mubr.bf16.mxu0 %v353_v32  ;;  %v1413_v42 = vpop.f32.mrf.mxu1  ;;  %v325_v45 = vmax.f32 %v211_v36, 0.0  ;;  %v340_v35 = vmax.f32 %v270_v29, 0.0 }
  0xd8   :  { %v213_v40 = vpop.f32.mrf.mxu0  ;;  %1090 = vmatmul.mubr.bf16.vlgmr.msra.gmra.mxu0 %v354_v34  ;;  %v341_v31 = vmax.f32 %v275_v25, 0.0  ;;  %v339_v34 = vmax.f32 %v267_v27, 0.0  ;;  %v286_v24 = vadd.f32 %v1413_v42, %v1397_v15 }
  0xd9   :  { %v214_v41 = vadd.f32 %v1397_v15, %v213_v40  ;;  %v328_v43 = vmax.f32 %v222_v37, 0.0  ;;  %v277_v47 = vpop.f32.mrf.mxu1 }
  0xda   :  { %v1015_v44 = vpop.f32.mrf.mxu0  ;;  %v278_v26 = vadd.f32 %v1397_v15, %v277_v47  ;;  %v362_v40 = vpack.c.bf16 %v340_v35, %v339_v34 }
  0xdb   :  { %v326_v46 = vmax.f32 %v214_v41, 0.0  ;;  %v356_v51 = vpack.c.bf16 %v328_v43, %v327_v48  ;;  %v1415_v53 = vpop.f32.mrf.mxu1  ;;  %v235_v56 = vadd.f32 %v1015_v44, %v1397_v15 }
  0xdc   :  { %v226_v49 = vpop.f32.mrf.mxu0  ;;  %v342_v32 = vmax.f32 %v278_v26, 0.0  ;;  %v299_v33 = vadd.f32 %v1415_v53, %v1397_v15 }
  0xdd   :  { %v355_v50 = vpack.c.bf16 %v326_v46, %v325_v45  ;;  %v227_v54 = vadd.f32 %v1397_v15, %v226_v49  ;;  %v290_v61 = vpop.f32.mrf.mxu1  ;;  %v331_v0 = vmax.f32 %v235_v56, 0.0  ;;  %v343_v45 = vmax.f32 %v283_v16, 0.0 }
  0xde   :  { %v1016_v52 = vpop.f32.mrf.mxu0  ;;  %v363_v37 = vpack.c.bf16 %v342_v32, %v341_v31  ;;  %v291_v38 = vadd.f32 %v1397_v15, %v290_v61  ;;  %v344_v46 = vmax.f32 %v286_v24, 0.0 }
  0xdf   :  { %v238_v55 = vadd.f32 %v1016_v52, %v1397_v15  ;;  %1093 = vmatprep.mubr.bf16.mxu0 %v355_v50  ;;  %v329_v62 = vmax.f32 %v227_v54, 0.0  ;;  %v1032_v8 = vpop.f32.mrf.mxu1 }
  0xe0   :  { %v229_v57 = vpop.f32.mrf.mxu0  ;;  %1094 = vmatmul.mubr.bf16.gmra.mxu0 %v356_v51  ;;  %v345_v43 = vmax.f32 %v291_v38, 0.0  ;;  %v364_v51 = vpack.c.bf16 %v344_v46, %v343_v45  ;;  %v302_v52 = vadd.f32 %v1032_v8, %v1397_v15 }
  0xe1   :  { %v230_v58 = vadd.f32 %v1397_v15, %v229_v57  ;;  %v332_v59 = vmax.f32 %v238_v55, 0.0  ;;  %v293_v18 = vpop.f32.mrf.mxu1  ;;  %v347_v55 = vmax.f32 %v299_v33, 0.0 }
  0xe2   :  { %v1019_v60 = vpop.f32.mrf.mxu0  ;;  %v294_v39 = vadd.f32 %v1397_v15, %v293_v18  ;;  %v348_v56 = vmax.f32 %v302_v52, 0.0 }
  0xe3   :  { %v330_v63 = vmax.f32 %v230_v58, 0.0  ;;  %v358_v6 = vpack.c.bf16 %v332_v59, %v331_v0  ;;  %v251_v5 = vadd.f32 %v1019_v60, %v1397_v15  ;;  %v1035_v30 = vpop.f32.mrf.mxu1 }
  0xe4   :  { %v242_v1 = vpop.f32.mrf.mxu0  ;;  %v346_v44 = vmax.f32 %v294_v39, 0.0  ;;  %v366_v58 = vpack.c.bf16 %v348_v56, %v347_v55  ;;  %v315_v59 = vadd.f32 %v1035_v30, %v1397_v15 }
  0xe5   :  { %v357_v2 = vpack.c.bf16 %v330_v63, %v329_v62  ;;  %v243_v12 = vadd.f32 %v1397_v15, %v242_v1  ;;  %v335_v21 = vmax.f32 %v251_v5, 0.0  ;;  %v306_v36 = vpop.f32.mrf.mxu1 }
  0xe6   :  { %v1020_v7 = vpop.f32.mrf.mxu0  ;;  %v365_v48 = vpack.c.bf16 %v346_v44, %v345_v43  ;;  %v307_v49 = vadd.f32 %v1397_v15, %v306_v36  ;;  %v351_v61 = vmax.f32 %v315_v59, 0.0 }
  0xe7   :  { %v254_v13 = vadd.f32 %v1020_v7, %v1397_v15  ;;  %1097 = vmatprep.mubr.bf16.mxu0 %v357_v2  ;;  %v333_v19 = vmax.f32 %v243_v12, 0.0  ;;  %v1036_v41 = vpop.f32.mrf.mxu1 }
  0xe8   :  { %v245_v9 = vpop.f32.mrf.mxu0  ;;  %1098 = vmatmul.mubr.bf16.gmra.mxu0 %v358_v6  ;;  %v349_v42 = vmax.f32 %v307_v49, 0.0  ;;  %v318_v60 = vadd.f32 %v1036_v41, %v1397_v15 }
  0xe9   :  { %v246_v11 = vadd.f32 %v1397_v15, %v245_v9  ;;  %v336_v17 = vmax.f32 %v254_v13, 0.0  ;;  %v309_v47 = vpop.f32.mrf.mxu1 }
  0xea   :  { %v310_v50 = vadd.f32 %v1397_v15, %v309_v47  ;;  %v352_v62 = vmax.f32 %v318_v60, 0.0 }
  0xeb   :  { %v334_v20 = vmax.f32 %v246_v11, 0.0  ;;  %v360_v28 = vpack.c.bf16 %v336_v17, %v335_v21  ;;  %v1043_v53 = vpop.f32.mrf.mxu1  ;;  %v1455_v17 = vld [vmem:[%s1631_s5] ss:$0 sm:$0xff] }
  0xec   :  { %v350_v54 = vmax.f32 %v310_v50, 0.0  ;;  %v368_v63 = vpack.c.bf16 %v352_v62, %v351_v61 }
  0xed   :  { %v359_v22 = vpack.c.bf16 %v334_v20, %v333_v19  ;;  %v483_v0 = vpop.f32.mrf.mxu1 }
  0xee   :  { %v367_v57 = vpack.c.bf16 %v350_v54, %v349_v42 }
  0xef   :  { %1101 = vmatprep.mubr.bf16.mxu0 %v359_v22  ;;  %v1044_v1 = vpop.f32.mrf.mxu1 }
  0xf0   :  { %1102 = vmatmul.mubr.bf16.gmra.mxu0 %v360_v28 }
  0xf1   :  { %1105 = vmatprep.mubr.bf16.mxu0 %v361_v23  ;;  %v486_v2 = vpop.f32.mrf.mxu1 }
  0xf3   :  { %v1047_v3 = vpop.f32.mrf.mxu1 }
  0xf5   :  { %v499_v4 = vpop.f32.mrf.mxu1 }
  0xf7   :  { %v1048_v6 = vpop.f32.mrf.mxu1 }
  0xf8   :  { %1106 = vmatmul.mubr.bf16.gmra.mxu0 %v362_v40 }
  0xf9   :  { %1109 = vmatprep.mubr.bf16.mxu0 %v363_v37  ;;  %v502_v7 = vpop.f32.mrf.mxu1 }
  0xfb   :  { %v1051_v8 = vpop.f32.mrf.mxu1 }
  0xfd   :  { %v515_v12 = vpop.f32.mrf.mxu1 }
  0xff   :  { %v1052_v13 = vpop.f32.mrf.mxu1 }
 0x100   :  { %1110 = vmatmul.mubr.bf16.gmra.mxu0 %v364_v51 }
 0x101   :  { %1113 = vmatprep.mubr.bf16.mxu0 %v365_v48  ;;  %v518_v5 = vpop.f32.mrf.mxu1 }
 0x103   :  { %v1055_v9 = vpop.f32.mrf.mxu1 }
 0x105   :  { %v1446_v15 = vpop.f32.mrf.mxu1 }
 0x107   :  { %v1448_v10 = vpop.f32.mrf.mxu1 }
 0x108   :  { %1114 = vmatmul.mubr.bf16.gmra.mxu0 %v366_v58 }
 0x109   :  { %1117 = vmatprep.mubr.bf16.mxu0 %v367_v57  ;;  %v1450_v11 = vpop.f32.mrf.mxu1 }
 0x10b   :  { %v1457_v20 = vpop.f32.mrf.mxu1 }
 0x10d   :  { %v1465_v28 = vpop.f32.mrf.mxu1 }
 0x10f   :  { %v1060_v36 = vpop.f32.mrf.mxu1 }
 0x110   :  { %1118 = vmatmul.mubr.bf16.gmra.mxu0 %v368_v63 }
 0x111   :  { %v550_v41 = vpop.f32.mrf.mxu1 }
 0x113   :  { %v1063_v49 = vpop.f32.mrf.mxu1 }
 0x115   :  { %v563_v55 = vpop.f32.mrf.mxu1 }
 0x117   :  { %v1064_v62 = vpop.f32.mrf.mxu1 }
 0x198   :  { %v1091_v14 = vpop.f32.mrf.mxu0 }
 0x199   :  { %v701_v18 = vadd.f32 %v1091_v14, %v1043_v53 }
 0x19a   :  { %v692_v19 = vpop.f32.mrf.mxu0 }
 0x19b   :  { %v828_v21 = vadd.f32 %v1455_v17, %v701_v18  ;;  %v693_v22 = vadd.f32 %v692_v19, %v483_v0 }
 0x19c   :  { %v1092_v23 = vpop.f32.mrf.mxu0 }
 0x19d   :  { %861 = vst.msk [vmem:[%s1632_s6 + $0x10] sm:$0xff] %vm858_vm1, %v828_v21  ;;  %v826_v25 = vadd.f32 %v1455_v17, %v693_v22  ;;  %v704_v26 = vadd.f32 %v1092_v23, %v1044_v1 }
 0x19e   :  { %v695_v27 = vpop.f32.mrf.mxu0 }
 0x19f   :  { %859 = vst.msk [vmem:[%s1632_s6] sm:$0xff] %vm858_vm1, %v826_v25  ;;  %v829_v29 = vadd.f32 %v1455_v17, %v704_v26  ;;  %v696_v30 = vadd.f32 %v695_v27, %v486_v2 }
 0x1a0   :  { %v1095_v31 = vpop.f32.mrf.mxu0 }
 0x1a1   :  { %862 = vst.msk [vmem:[%s1632_s6 + $0x18] sm:$0xff] %vm858_vm1, %v829_v29  ;;  %v827_v32 = vadd.f32 %v1455_v17, %v696_v30  ;;  %v717_v34 = vadd.f32 %v1095_v31, %v1047_v3 }
 0x1a2   :  { %v708_v35 = vpop.f32.mrf.mxu0 }
 0x1a3   :  { %860 = vst.msk [vmem:[%s1632_s6 + $0x8] sm:$0xff] %vm858_vm1, %v827_v32  ;;  %v832_v37 = vadd.f32 %v1455_v17, %v717_v34  ;;  %v709_v38 = vadd.f32 %v708_v35, %v499_v4  ;;  %v566_v4 = vpop.f32.mrf.mxu1 }
 0x1a4   :  { %v1096_v39 = vpop.f32.mrf.mxu0 }
 0x1a5   :  { %865 = vst.msk [vmem:[%s1632_s6 + $0x30] sm:$0xff] %vm858_vm1, %v832_v37  ;;  %v830_v40 = vadd.f32 %v1455_v17, %v709_v38  ;;  %v720_v16 = vadd.f32 %v1096_v39, %v1048_v6 }
 0x1a6   :  { %v711_v24 = vpop.f32.mrf.mxu0 }
 0x1a7   :  { %863 = vst.msk [vmem:[%s1632_s6 + $0x20] sm:$0xff] %vm858_vm1, %v830_v40  ;;  %v833_v43 = vadd.f32 %v1455_v17, %v720_v16  ;;  %v712_v44 = vadd.f32 %v711_v24, %v502_v7 }
 0x1a8   :  { %v1099_v45 = vpop.f32.mrf.mxu0 }
 0x1a9   :  { %866 = vst.msk [vmem:[%s1632_s6 + $0x38] sm:$0xff] %vm858_vm1, %v833_v43  ;;  %v831_v46 = vadd.f32 %v1455_v17, %v712_v44  ;;  %v733_v47 = vadd.f32 %v1099_v45, %v1051_v8 }
 0x1aa   :  { %v724_v48 = vpop.f32.mrf.mxu0 }
 0x1ab   :  { %864 = vst.msk [vmem:[%s1632_s6 + $0x28] sm:$0xff] %vm858_vm1, %v831_v46  ;;  %v836_v50 = vadd.f32 %v1455_v17, %v733_v47  ;;  %v725_v51 = vadd.f32 %v724_v48, %v515_v12 }
 0x1ac   :  { %v1100_v33 = vpop.f32.mrf.mxu0 }
 0x1ad   :  { %869 = vst.msk [vmem:[%s1632_s6 + $0x50] sm:$0xff] %vm858_vm1, %v836_v50  ;;  %v834_v52 = vadd.f32 %v1455_v17, %v725_v51  ;;  %v736_v42 = vadd.f32 %v1100_v33, %v1052_v13 }
 0x1ae   :  { %v727_v54 = vpop.f32.mrf.mxu0 }
 0x1af   :  { %867 = vst.msk [vmem:[%s1632_s6 + $0x40] sm:$0xff] %vm858_vm1, %v834_v52  ;;  %v837_v56 = vadd.f32 %v1455_v17, %v736_v42  ;;  %v728_v57 = vadd.f32 %v727_v54, %v518_v5 }
 0x1b0   :  { %v1103_v58 = vpop.f32.mrf.mxu0 }
 0x1b1   :  { %870 = vst.msk [vmem:[%s1632_s6 + $0x58] sm:$0xff] %vm858_vm1, %v837_v56  ;;  %v835_v59 = vadd.f32 %v1455_v17, %v728_v57  ;;  %v749_v60 = vadd.f32 %v1103_v58, %v1055_v9  ;;  %v1067_v9 = vpop.f32.mrf.mxu1 }
 0x1b2   :  { %v740_v61 = vpop.f32.mrf.mxu0 }
 0x1b3   :  { %868 = vst.msk [vmem:[%s1632_s6 + $0x48] sm:$0xff] %vm858_vm1, %v835_v59  ;;  %v840_v63 = vadd.f32 %v1455_v17, %v749_v60  ;;  %v741_v53 = vadd.f32 %v740_v61, %v1446_v15 }
 0x1b4   :  { %v1104_v0 = vpop.f32.mrf.mxu0 }
 0x1b5   :  { %873 = vst.msk [vmem:[%s1632_s6 + $0x70] sm:$0xff] %vm858_vm1, %v840_v63  ;;  %v838_v1 = vadd.f32 %v1455_v17, %v741_v53  ;;  %v752_v2 = vadd.f32 %v1104_v0, %v1448_v10 }
 0x1b6   :  { %v743_v3 = vpop.f32.mrf.mxu0 }
 0x1b7   :  { %871 = vst.msk [vmem:[%s1632_s6 + $0x60] sm:$0xff] %vm858_vm1, %v838_v1  ;;  %v841_v6 = vadd.f32 %v1455_v17, %v752_v2  ;;  %v744_v7 = vadd.f32 %v743_v3, %v1450_v11 }
 0x1b8   :  { %v1107_v8 = vpop.f32.mrf.mxu0 }
 0x1b9   :  { %874 = vst.msk [vmem:[%s1632_s6 + $0x78] sm:$0xff] %vm858_vm1, %v841_v6  ;;  %v839_v12 = vadd.f32 %v1455_v17, %v744_v7  ;;  %v765_v13 = vadd.f32 %v1107_v8, %v1457_v20  ;;  %v579_v20 = vpop.f32.mrf.mxu1 }
 0x1ba   :  { %v756_v5 = vpop.f32.mrf.mxu0 }
 0x1bb   :  { %872 = vst.msk [vmem:[%s1632_s6 + $0x68] sm:$0xff] %vm858_vm1, %v839_v12  ;;  %v844_v15 = vadd.f32 %v1455_v17, %v765_v13  ;;  %v757_v10 = vadd.f32 %v756_v5, %v1465_v28  ;;  %v1068_v28 = vpop.f32.mrf.mxu1 }
 0x1bc   :  { %v1108_v11 = vpop.f32.mrf.mxu0 }
 0x1bd   :  { %877 = vst.msk [vmem:[%s1632_s6 + $0x90] sm:$0xff] %vm858_vm1, %v844_v15  ;;  %v842_v14 = vadd.f32 %v1455_v17, %v757_v10  ;;  %v768_v18 = vadd.f32 %v1108_v11, %v1060_v36  ;;  %v582_v36 = vpop.f32.mrf.mxu1 }
 0x1be   :  { %v759_v19 = vpop.f32.mrf.mxu0 }
 0x1bf   :  { %875 = vst.msk [vmem:[%s1632_s6 + $0x80] sm:$0xff] %vm858_vm1, %v842_v14  ;;  %v845_v21 = vadd.f32 %v1455_v17, %v768_v18  ;;  %v760_v22 = vadd.f32 %v759_v19, %v550_v41  ;;  %v1071_v24 = vpop.f32.mrf.mxu1 }
 0x1c0   :  { %v1111_v23 = vpop.f32.mrf.mxu0 }
 0x1c1   :  { %878 = vst.msk [vmem:[%s1632_s6 + $0x98] sm:$0xff] %vm858_vm1, %v845_v21  ;;  %v843_v25 = vadd.f32 %v1455_v17, %v760_v22  ;;  %v781_v26 = vadd.f32 %v1111_v23, %v1063_v49  ;;  %v595_v48 = vpop.f32.mrf.mxu1 }
 0x1c2   :  { %v772_v27 = vpop.f32.mrf.mxu0 }
 0x1c3   :  { %876 = vst.msk [vmem:[%s1632_s6 + $0x88] sm:$0xff] %vm858_vm1, %v843_v25  ;;  %v848_v29 = vadd.f32 %v1455_v17, %v781_v26  ;;  %v773_v30 = vadd.f32 %v772_v27, %v563_v55  ;;  %v1072_v54 = vpop.f32.mrf.mxu1 }
 0x1c4   :  { %v1112_v31 = vpop.f32.mrf.mxu0 }
 0x1c5   :  { %881 = vst.msk [vmem:[%s1632_s6 + $0xb0] sm:$0xff] %vm858_vm1, %v848_v29  ;;  %v846_v32 = vadd.f32 %v1455_v17, %v773_v30  ;;  %v784_v34 = vadd.f32 %v1112_v31, %v1064_v62  ;;  %v598_v61 = vpop.f32.mrf.mxu1 }
 0x1c6   :  { %v775_v35 = vpop.f32.mrf.mxu0 }
 0x1c7   :  { %879 = vst.msk [vmem:[%s1632_s6 + $0xa0] sm:$0xff] %vm858_vm1, %v846_v32  ;;  %v849_v37 = vadd.f32 %v1455_v17, %v784_v34  ;;  %v776_v38 = vadd.f32 %v775_v35, %v566_v4 }
 0x1c8   :  { %v1115_v39 = vpop.f32.mrf.mxu0 }
 0x1c9   :  { %882 = vst.msk [vmem:[%s1632_s6 + $0xb8] sm:$0xff] %vm858_vm1, %v849_v37  ;;  %v847_v40 = vadd.f32 %v1455_v17, %v776_v38  ;;  %v797_v16 = vadd.f32 %v1115_v39, %v1067_v9 }
 0x1ca   :  { %v788_v41 = vpop.f32.mrf.mxu0 }
 0x1cb   :  { %880 = vst.msk [vmem:[%s1632_s6 + $0xa8] sm:$0xff] %vm858_vm1, %v847_v40  ;;  %v852_v43 = vadd.f32 %v1455_v17, %v797_v16  ;;  %v789_v44 = vadd.f32 %v788_v41, %v579_v20 }
 0x1cc   :  { %v1116_v45 = vpop.f32.mrf.mxu0 }
 0x1cd   :  { %885 = vst.msk [vmem:[%s1632_s6 + $0xd0] sm:$0xff] %vm858_vm1, %v852_v43  ;;  %v850_v46 = vadd.f32 %v1455_v17, %v789_v44  ;;  %v800_v47 = vadd.f32 %v1116_v45, %v1068_v28 }
 0x1ce   :  { %v791_v49 = vpop.f32.mrf.mxu0 }
 0x1cf   :  { %883 = vst.msk [vmem:[%s1632_s6 + $0xc0] sm:$0xff] %vm858_vm1, %v850_v46  ;;  %v853_v50 = vadd.f32 %v1455_v17, %v800_v47  ;;  %v792_v51 = vadd.f32 %v791_v49, %v582_v36 }
 0x1d0   :  { %v1119_v33 = vpop.f32.mrf.mxu0 }
 0x1d1   :  { %886 = vst.msk [vmem:[%s1632_s6 + $0xd8] sm:$0xff] %vm858_vm1, %v853_v50  ;;  %v851_v52 = vadd.f32 %v1455_v17, %v792_v51  ;;  %v813_v42 = vadd.f32 %v1119_v33, %v1071_v24 }
 0x1d2   :  { %v804_v55 = vpop.f32.mrf.mxu0 }
 0x1d3   :  { %884 = vst.msk [vmem:[%s1632_s6 + $0xc8] sm:$0xff] %vm858_vm1, %v851_v52  ;;  %v856_v56 = vadd.f32 %v1455_v17, %v813_v42  ;;  %v805_v57 = vadd.f32 %v804_v55, %v595_v48 }
 0x1d4   :  { %v1120_v58 = vpop.f32.mrf.mxu0 }
 0x1d5   :  { %889 = vst.msk [vmem:[%s1632_s6 + $0xf0] sm:$0xff] %vm858_vm1, %v856_v56  ;;  %v854_v59 = vadd.f32 %v1455_v17, %v805_v57  ;;  %v816_v60 = vadd.f32 %v1120_v58, %v1072_v54 }
 0x1d6   :  { %v807_v62 = vpop.f32.mrf.mxu0 }
 0x1d7   :  { %887 = vst.msk [vmem:[%s1632_s6 + $0xe0] sm:$0xff] %vm858_vm1, %v854_v59  ;;  %v857_v63 = vadd.f32 %v1455_v17, %v816_v60  ;;  %v808_v53 = vadd.f32 %v807_v62, %v598_v61 }
 0x1d9   :  { %890 = vst.msk [vmem:[%s1632_s6 + $0xf8] sm:$0xff] %vm858_vm1, %v857_v63  ;;  %v855_v0 = vadd.f32 %v1455_v17, %v808_v53 }
 0x1db   :  { %888 = vst.msk [vmem:[%s1632_s6 + $0xe8] sm:$0xff] %vm858_vm1, %v855_v0 }

</bundles_post_ra>
